<compile_context>
chip_gen: v5e
topology: v5e:2x2
jax: 0.10.0
libtpu: 0.0.40
codegen_flags: <defaults>
</compile_context>

<pallas_src>
import jax
import jax.numpy as jnp
from jax import lax
from jax.experimental import pallas as pl
from jax.experimental.pallas import tpu as pltpu


def lstm_kernel(x_ref,       # (S, B, 1)   x transposed: one scalar per timestep
                wx_ref,      # (1, 4H)     [W_gx | W_ix | W_fx | W_ox] (input_dim == 1)
                wh_ref,      # (H, 4H)     [W_gh^T | W_ih^T | W_fh^T | W_oh^T]
                ball_ref,    # (B, 4H)     per-gate biases, broadcast over hidden dim
                wph_ref,     # (H, C)      W_ph^T
                bp_ref,      # (B, 1)
                out_ref,     # (B, C)
                xproj_ref):  # VMEM scratch (S, B, 4H)
    S, B, _ = x_ref.shape
    H = wh_ref.shape[0]
    H4 = wh_ref.shape[1]

    # Hoisted input projection + gate bias for every timestep: one VPU pass,
    # done once (instead of 4 broadcasts + 4 muls + 4 bias adds per serial step).
    xproj_ref[...] = (x_ref[...] * wx_ref[...][None, :, :]
                      + ball_ref[...][None, :, :])

    # Lane mask selecting the g-gate columns (tanh) vs i/f/o columns (sigmoid).
    gate_mask = lax.broadcasted_iota(jnp.int32, (B, H4), 1) < H

    wh = wh_ref[...]  # hoisted weight load (loop is fully unrolled anyway)

    def step(t, carry):
        h, c = carry
        # Fused gate pre-activation: one (B,H)@(H,4H) MXU matmul -> (B, 4H).
        pre = xproj_ref[t] + jnp.dot(h, wh, preferred_element_type=jnp.float32)
        # Two full-vreg EUP pushes + one VPU select instead of 4 partial ones.
        act = jnp.where(gate_mask, jnp.tanh(pre), jax.nn.sigmoid(pre))
        g = act[:, 0:H]
        i = act[:, H:2 * H]
        f = act[:, 2 * H:3 * H]
        o = act[:, 3 * H:4 * H]
        c_new = g * i + c * f
        h_new = jnp.tanh(c_new) * o
        return h_new, c_new

    h0 = jnp.zeros((B, H), jnp.float32)
    c0 = jnp.zeros((B, H), jnp.float32)
    h, _ = lax.fori_loop(0, S, step, (h0, c0), unroll=True)

    # p = (W_ph @ h_T + b_p)^T computed directly in (B, C) layout.
    p = jnp.dot(h, wph_ref[...], preferred_element_type=jnp.float32) + bp_ref[...]
    # nn.Softmax(dim=1) of the (C, B) logits == softmax over the BATCH axis,
    # which is axis 0 in this layout; the result already equals torch.t(y_t).
    p_max = jnp.max(p, axis=0, keepdims=True)
    e = jnp.exp(p - p_max)
    out_ref[...] = e / jnp.sum(e, axis=0, keepdims=True)


def lstm_forward(x, params):
    """x: (batch, seq) float32  ->  (batch, num_classes) float32 (== torch.t(y_t))."""
    B, S = x.shape
    H = params["W_gh"].shape[0]
    C = params["W_ph"].shape[0]

    # Fused recurrent weight, columns ordered [g, i, f, o]: h @ W_h == (W_*h @ h^T)^T.
    W_h = jnp.concatenate([params["W_gh"].T, params["W_ih"].T,
                           params["W_fh"].T, params["W_oh"].T], axis=1)        # (H, 4H)
    # Fused input weights as one row (input_dim == 1 -> the matmul is an outer product).
    W_x = jnp.concatenate([params["W_gx"][:, 0], params["W_ix"][:, 0],
                           params["W_fx"][:, 0], params["W_ox"][:, 0]]
                          ).reshape(1, 4 * H)                                  # (1, 4H)
    # Gate biases (shape (B,) in the reference, broadcast over the hidden dim).
    b_all = jnp.concatenate(
        [jnp.broadcast_to(params[k][:, None], (B, H))
         for k in ("b_g", "b_i", "b_f", "b_o")], axis=1)                       # (B, 4H)
    W_p = params["W_ph"].T                                                     # (H, C)
    b_p = params["b_p"].reshape(B, 1)                                          # (B, 1)

    x_in = x.T[:, :, None]                                                     # (S, B, 1)

    vmem = pl.BlockSpec(memory_space=pltpu.MemorySpace.VMEM)
    out = pl.pallas_call(
        lstm_kernel,
        out_shape=jax.ShapeDtypeStruct((B, C), jnp.float32),
        in_specs=[vmem] * 6,
        out_specs=vmem,
        scratch_shapes=[pltpu.VMEM((S, B, 4 * H), jnp.float32)],
    )(x_in, W_x, W_h, b_all, W_p, b_p)
    return out  # (B, C), already batch-major: no wrapper-side transpose needed.


def xavier_uniform(key, shape):
    fan_out, fan_in = shape
    bound = (6.0 / (fan_in + fan_out)) ** 0.5
    return jax.random.uniform(key, shape, jnp.float32, -bound, bound)


def init_params(key, seq_length, input_dim, num_hidden, num_classes, batch_size):
    ks = jax.random.split(key, 9)
    return {
        "W_gx": xavier_uniform(ks[0], (num_hidden, input_dim)),
        "W_gh": xavier_uniform(ks[1], (num_hidden, num_hidden)),
        "W_ix": xavier_uniform(ks[2], (num_hidden, input_dim)),
        "W_ih": xavier_uniform(ks[3], (num_hidden, num_hidden)),
        "W_fx": xavier_uniform(ks[4], (num_hidden, input_dim)),
        "W_fh": xavier_uniform(ks[5], (num_hidden, num_hidden)),
        "W_ox": xavier_uniform(ks[6], (num_hidden, input_dim)),
        "W_oh": xavier_uniform(ks[7], (num_hidden, num_hidden)),
        "W_ph": xavier_uniform(ks[8], (num_classes, num_hidden)),
        "b_g": jnp.zeros((batch_size,), jnp.float32),
        "b_i": jnp.zeros((batch_size,), jnp.float32),
        "b_f": jnp.zeros((batch_size,), jnp.float32),
        "b_o": jnp.zeros((batch_size,), jnp.float32),
        "b_p": jnp.zeros((batch_size,), jnp.float32),
    }


def lstm_reference(x, p):
    """Pure-JAX mirror of the PyTorch forward, for verification."""
    B, S = x.shape
    H = p["W_gh"].shape[0]
    h = jnp.zeros((H, B), jnp.float32)
    c = jnp.zeros((H, B), jnp.float32)
    for t in range(S):
        x_t = x[:, t].reshape(1, B)
        g = jnp.tanh(p["W_gx"] @ x_t + p["W_gh"] @ h + p["b_g"])
        i = jax.nn.sigmoid(p["W_ix"] @ x_t + p["W_ih"] @ h + p["b_i"])
        f = jax.nn.sigmoid(p["W_fx"] @ x_t + p["W_fh"] @ h + p["b_f"])
        o = jax.nn.sigmoid(p["W_ox"] @ x_t + p["W_oh"] @ h + p["b_o"])
        c = g * i + c * f
        h = jnp.tanh(c) * o
    pt = p["W_ph"] @ h + p["b_p"]
    y = jax.nn.softmax(pt, axis=1)   # softmax over the batch axis, as in the reference
    return y.T


if __name__ == "__main__":
    seq_length = 16
    input_dim = 1       # the reference forward only works with input_dim == 1
    num_hidden = 32
    num_classes = 10
    batch_size = 8

    key = jax.random.PRNGKey(0)
    k_param, k_x = jax.random.split(key)
    params = init_params(k_param, seq_length, input_dim,
                         num_hidden, num_classes, batch_size)
    x = jax.random.normal(k_x, (batch_size, seq_length), jnp.float32)

    y = lstm_forward(x, params)
    y = jax.block_until_ready(y)

    y_ref = lstm_reference(x, params)
    assert y.shape == (batch_size, num_classes)
    assert jnp.allclose(y, y_ref, atol=1e-5, rtol=1e-5), "mismatch vs JAX reference"

    print("KERNEL_OK")
</pallas_src>

<mosaic_0001>
module attributes {stable_mosaic.version = 11 : i64} {
  func.func @lstm_kernel(%arg0: memref<16x8x1xf32, #tpu.memory_space<vmem>>, %arg1: memref<1x128xf32, #tpu.memory_space<vmem>>, %arg2: memref<32x128xf32, #tpu.memory_space<vmem>>, %arg3: memref<8x128xf32, #tpu.memory_space<vmem>>, %arg4: memref<32x10xf32, #tpu.memory_space<vmem>>, %arg5: memref<8x1xf32, #tpu.memory_space<vmem>>, %arg6: memref<8x10xf32, #tpu.memory_space<vmem>>, %arg7: memref<16x8x128xf32, #tpu.memory_space<vmem>>) attributes {dimension_semantics = [], scalar_prefetch = 0 : i64, scratch_operands = 1 : i64, tpu.core_type = #tpu.core_type<tc>} {
    %c0 = arith.constant 0 : index
    %c0_0 = arith.constant 0 : index
    %c0_1 = arith.constant 0 : index
    %0 = vector.load %arg0[%c0, %c0_0, %c0_1] : memref<16x8x1xf32, #tpu.memory_space<vmem>>, vector<16x8x1xf32>
    %c0_2 = arith.constant 0 : index
    %c0_3 = arith.constant 0 : index
    %1 = vector.load %arg1[%c0_2, %c0_3] : memref<1x128xf32, #tpu.memory_space<vmem>>, vector<1x128xf32>
    %2 = vector.shape_cast %1 : vector<1x128xf32> to vector<1x1x128xf32>
    %3 = vector.broadcast %0 : vector<16x8x1xf32> to vector<16x8x128xf32>
    %4 = vector.broadcast %2 : vector<1x1x128xf32> to vector<16x8x128xf32>
    %5 = arith.mulf %3, %4 : vector<16x8x128xf32>
    %c0_4 = arith.constant 0 : index
    %c0_5 = arith.constant 0 : index
    %6 = vector.load %arg3[%c0_4, %c0_5] : memref<8x128xf32, #tpu.memory_space<vmem>>, vector<8x128xf32>
    %7 = vector.shape_cast %6 : vector<8x128xf32> to vector<1x8x128xf32>
    %8 = vector.broadcast %7 : vector<1x8x128xf32> to vector<16x8x128xf32>
    %9 = arith.addf %5, %8 : vector<16x8x128xf32>
    %c0_6 = arith.constant 0 : index
    %c0_7 = arith.constant 0 : index
    %c0_8 = arith.constant 0 : index
    %10 = vector.load %arg7[%c0_6, %c0_7, %c0_8] : memref<16x8x128xf32, #tpu.memory_space<vmem>>, vector<16x8x128xf32>
    tpu.vector_store %arg7[%c0_6, %c0_7, %c0_8], %9 {strides = array<i32>} : memref<16x8x128xf32, #tpu.memory_space<vmem>>, vector<16x8x128xf32>,
    %11 = tpu.iota {dimensions = array<i32: 1>} : vector<8x128xi32>
    %c32_i32 = arith.constant 32 : i32
    %12 = vector.broadcast %c32_i32 : i32 to vector<8x128xi32>
    %13 = arith.cmpi slt, %11, %12 : vector<8x128xi32>
    %c0_9 = arith.constant 0 : index
    %c0_10 = arith.constant 0 : index
    %14 = vector.load %arg2[%c0_9, %c0_10] : memref<32x128xf32, #tpu.memory_space<vmem>>, vector<32x128xf32>
    %cst = arith.constant 0.000000e+00 : f32
    %15 = vector.broadcast %cst : f32 to vector<8x32xf32>
    %cst_11 = arith.constant 0.000000e+00 : f32
    %16 = vector.broadcast %cst_11 : f32 to vector<8x32xf32>
    %c0_i32 = arith.constant 0 : i32
    %17 = arith.index_cast %c0_i32 : i32 to index
    %c0_12 = arith.constant 0 : index
    %c0_13 = arith.constant 0 : index
    %18 = vector.load %arg7[%17, %c0_12, %c0_13] : memref<16x8x128xf32, #tpu.memory_space<vmem>>, vector<1x8x128xf32>
    %19 = vector.shape_cast %18 : vector<1x8x128xf32> to vector<8x128xf32>
    %cst_14 = arith.constant dense<0.000000e+00> : vector<8x128xf32>
    %20 = tpu.matmul %15, %14, %cst_14 {dimension_numbers = #tpu.dot_dimension_numbers<[1], [0], [0], [1], [0, 0, 1, 1], [], []>} : vector<8x32xf32>, vector<32x128xf32>, vector<8x128xf32> -> vector<8x128xf32>
    %21 = arith.addf %19, %20 : vector<8x128xf32>
    %22 = math.tanh %21 : vector<8x128xf32>
    %23 = arith.negf %21 : vector<8x128xf32>
    %24 = math.exp %23 : vector<8x128xf32>
    %cst_15 = arith.constant 1.000000e+00 : f32
    %25 = vector.broadcast %cst_15 : f32 to vector<8x128xf32>
    %26 = arith.addf %25, %24 : vector<8x128xf32>
    %27 = arith.divf %25, %26 : vector<8x128xf32>
    %28 = arith.select %13, %22, %27 : vector<8x128xi1>, vector<8x128xf32>
    %29 = vector.extract_strided_slice %28 {offsets = [0, 0], sizes = [8, 32], strides = [1, 1]} : vector<8x128xf32> to vector<8x32xf32>
    %30 = vector.extract_strided_slice %28 {offsets = [0, 32], sizes = [8, 32], strides = [1, 1]} : vector<8x128xf32> to vector<8x32xf32>
    %31 = vector.extract_strided_slice %28 {offsets = [0, 64], sizes = [8, 32], strides = [1, 1]} : vector<8x128xf32> to vector<8x32xf32>
    %32 = vector.extract_strided_slice %28 {offsets = [0, 96], sizes = [8, 32], strides = [1, 1]} : vector<8x128xf32> to vector<8x32xf32>
    %33 = arith.mulf %29, %30 : vector<8x32xf32>
    %34 = arith.mulf %16, %31 : vector<8x32xf32>
    %35 = arith.addf %33, %34 : vector<8x32xf32>
    %36 = math.tanh %35 : vector<8x32xf32>
    %37 = arith.mulf %36, %32 : vector<8x32xf32>
    %c1_i32 = arith.constant 1 : i32
    %38 = arith.index_cast %c1_i32 : i32 to index
    %c0_16 = arith.constant 0 : index
    %c0_17 = arith.constant 0 : index
    %39 = vector.load %arg7[%38, %c0_16, %c0_17] : memref<16x8x128xf32, #tpu.memory_space<vmem>>, vector<1x8x128xf32>
    %40 = vector.shape_cast %39 : vector<1x8x128xf32> to vector<8x128xf32>
    %cst_18 = arith.constant dense<0.000000e+00> : vector<8x128xf32>
    %41 = tpu.matmul %37, %14, %cst_18 {dimension_numbers = #tpu.dot_dimension_numbers<[1], [0], [0], [1], [0, 0, 1, 1], [], []>} : vector<8x32xf32>, vector<32x128xf32>, vector<8x128xf32> -> vector<8x128xf32>
    %42 = arith.addf %40, %41 : vector<8x128xf32>
    %43 = math.tanh %42 : vector<8x128xf32>
    %44 = arith.negf %42 : vector<8x128xf32>
    %45 = math.exp %44 : vector<8x128xf32>
    %cst_19 = arith.constant 1.000000e+00 : f32
    %46 = vector.broadcast %cst_19 : f32 to vector<8x128xf32>
    %47 = arith.addf %46, %45 : vector<8x128xf32>
    %48 = arith.divf %46, %47 : vector<8x128xf32>
    %49 = arith.select %13, %43, %48 : vector<8x128xi1>, vector<8x128xf32>
    %50 = vector.extract_strided_slice %49 {offsets = [0, 0], sizes = [8, 32], strides = [1, 1]} : vector<8x128xf32> to vector<8x32xf32>
    %51 = vector.extract_strided_slice %49 {offsets = [0, 32], sizes = [8, 32], strides = [1, 1]} : vector<8x128xf32> to vector<8x32xf32>
    %52 = vector.extract_strided_slice %49 {offsets = [0, 64], sizes = [8, 32], strides = [1, 1]} : vector<8x128xf32> to vector<8x32xf32>
    %53 = vector.extract_strided_slice %49 {offsets = [0, 96], sizes = [8, 32], strides = [1, 1]} : vector<8x128xf32> to vector<8x32xf32>
    %54 = arith.mulf %50, %51 : vector<8x32xf32>
    %55 = arith.mulf %35, %52 : vector<8x32xf32>
    %56 = arith.addf %54, %55 : vector<8x32xf32>
    %57 = math.tanh %56 : vector<8x32xf32>
    %58 = arith.mulf %57, %53 : vector<8x32xf32>
    %c2_i32 = arith.constant 2 : i32
    %59 = arith.index_cast %c2_i32 : i32 to index
    %c0_20 = arith.constant 0 : index
    %c0_21 = arith.constant 0 : index
    %60 = vector.load %arg7[%59, %c0_20, %c0_21] : memref<16x8x128xf32, #tpu.memory_space<vmem>>, vector<1x8x128xf32>
    %61 = vector.shape_cast %60 : vector<1x8x128xf32> to vector<8x128xf32>
    %cst_22 = arith.constant dense<0.000000e+00> : vector<8x128xf32>
    %62 = tpu.matmul %58, %14, %cst_22 {dimension_numbers = #tpu.dot_dimension_numbers<[1], [0], [0], [1], [0, 0, 1, 1], [], []>} : vector<8x32xf32>, vector<32x128xf32>, vector<8x128xf32> -> vector<8x128xf32>
    %63 = arith.addf %61, %62 : vector<8x128xf32>
    %64 = math.tanh %63 : vector<8x128xf32>
    %65 = arith.negf %63 : vector<8x128xf32>
    %66 = math.exp %65 : vector<8x128xf32>
    %cst_23 = arith.constant 1.000000e+00 : f32
    %67 = vector.broadcast %cst_23 : f32 to vector<8x128xf32>
    %68 = arith.addf %67, %66 : vector<8x128xf32>
    %69 = arith.divf %67, %68 : vector<8x128xf32>
    %70 = arith.select %13, %64, %69 : vector<8x128xi1>, vector<8x128xf32>
    %71 = vector.extract_strided_slice %70 {offsets = [0, 0], sizes = [8, 32], strides = [1, 1]} : vector<8x128xf32> to vector<8x32xf32>
    %72 = vector.extract_strided_slice %70 {offsets = [0, 32], sizes = [8, 32], strides = [1, 1]} : vector<8x128xf32> to vector<8x32xf32>
    %73 = vector.extract_strided_slice %70 {offsets = [0, 64], sizes = [8, 32], strides = [1, 1]} : vector<8x128xf32> to vector<8x32xf32>
    %74 = vector.extract_strided_slice %70 {offsets = [0, 96], sizes = [8, 32], strides = [1, 1]} : vector<8x128xf32> to vector<8x32xf32>
    %75 = arith.mulf %71, %72 : vector<8x32xf32>
    %76 = arith.mulf %56, %73 : vector<8x32xf32>
    %77 = arith.addf %75, %76 : vector<8x32xf32>
    %78 = math.tanh %77 : vector<8x32xf32>
    %79 = arith.mulf %78, %74 : vector<8x32xf32>
    %c3_i32 = arith.constant 3 : i32
    %80 = arith.index_cast %c3_i32 : i32 to index
    %c0_24 = arith.constant 0 : index
    %c0_25 = arith.constant 0 : index
    %81 = vector.load %arg7[%80, %c0_24, %c0_25] : memref<16x8x128xf32, #tpu.memory_space<vmem>>, vector<1x8x128xf32>
    %82 = vector.shape_cast %81 : vector<1x8x128xf32> to vector<8x128xf32>
    %cst_26 = arith.constant dense<0.000000e+00> : vector<8x128xf32>
    %83 = tpu.matmul %79, %14, %cst_26 {dimension_numbers = #tpu.dot_dimension_numbers<[1], [0], [0], [1], [0, 0, 1, 1], [], []>} : vector<8x32xf32>, vector<32x128xf32>, vector<8x128xf32> -> vector<8x128xf32>
    %84 = arith.addf %82, %83 : vector<8x128xf32>
    %85 = math.tanh %84 : vector<8x128xf32>
    %86 = arith.negf %84 : vector<8x128xf32>
    %87 = math.exp %86 : vector<8x128xf32>
    %cst_27 = arith.constant 1.000000e+00 : f32
    %88 = vector.broadcast %cst_27 : f32 to vector<8x128xf32>
    %89 = arith.addf %88, %87 : vector<8x128xf32>
    %90 = arith.divf %88, %89 : vector<8x128xf32>
    %91 = arith.select %13, %85, %90 : vector<8x128xi1>, vector<8x128xf32>
    %92 = vector.extract_strided_slice %91 {offsets = [0, 0], sizes = [8, 32], strides = [1, 1]} : vector<8x128xf32> to vector<8x32xf32>
    %93 = vector.extract_strided_slice %91 {offsets = [0, 32], sizes = [8, 32], strides = [1, 1]} : vector<8x128xf32> to vector<8x32xf32>
    %94 = vector.extract_strided_slice %91 {offsets = [0, 64], sizes = [8, 32], strides = [1, 1]} : vector<8x128xf32> to vector<8x32xf32>
    %95 = vector.extract_strided_slice %91 {offsets = [0, 96], sizes = [8, 32], strides = [1, 1]} : vector<8x128xf32> to vector<8x32xf32>
    %96 = arith.mulf %92, %93 : vector<8x32xf32>
    %97 = arith.mulf %77, %94 : vector<8x32xf32>
    %98 = arith.addf %96, %97 : vector<8x32xf32>
    %99 = math.tanh %98 : vector<8x32xf32>
    %100 = arith.mulf %99, %95 : vector<8x32xf32>
    %c4_i32 = arith.constant 4 : i32
    %101 = arith.index_cast %c4_i32 : i32 to index
    %c0_28 = arith.constant 0 : index
    %c0_29 = arith.constant 0 : index
    %102 = vector.load %arg7[%101, %c0_28, %c0_29] : memref<16x8x128xf32, #tpu.memory_space<vmem>>, vector<1x8x128xf32>
    %103 = vector.shape_cast %102 : vector<1x8x128xf32> to vector<8x128xf32>
    %cst_30 = arith.constant dense<0.000000e+00> : vector<8x128xf32>
    %104 = tpu.matmul %100, %14, %cst_30 {dimension_numbers = #tpu.dot_dimension_numbers<[1], [0], [0], [1], [0, 0, 1, 1], [], []>} : vector<8x32xf32>, vector<32x128xf32>, vector<8x128xf32> -> vector<8x128xf32>
    %105 = arith.addf %103, %104 : vector<8x128xf32>
    %106 = math.tanh %105 : vector<8x128xf32>
    %107 = arith.negf %105 : vector<8x128xf32>
    %108 = math.exp %107 : vector<8x128xf32>
    %cst_31 = arith.constant 1.000000e+00 : f32
    %109 = vector.broadcast %cst_31 : f32 to vector<8x128xf32>
    %110 = arith.addf %109, %108 : vector<8x128xf32>
    %111 = arith.divf %109, %110 : vector<8x128xf32>
    %112 = arith.select %13, %106, %111 : vector<8x128xi1>, vector<8x128xf32>
    %113 = vector.extract_strided_slice %112 {offsets = [0, 0], sizes = [8, 32], strides = [1, 1]} : vector<8x128xf32> to vector<8x32xf32>
    %114 = vector.extract_strided_slice %112 {offsets = [0, 32], sizes = [8, 32], strides = [1, 1]} : vector<8x128xf32> to vector<8x32xf32>
    %115 = vector.extract_strided_slice %112 {offsets = [0, 64], sizes = [8, 32], strides = [1, 1]} : vector<8x128xf32> to vector<8x32xf32>
    %116 = vector.extract_strided_slice %112 {offsets = [0, 96], sizes = [8, 32], strides = [1, 1]} : vector<8x128xf32> to vector<8x32xf32>
    %117 = arith.mulf %113, %114 : vector<8x32xf32>
    %118 = arith.mulf %98, %115 : vector<8x32xf32>
    %119 = arith.addf %117, %118 : vector<8x32xf32>
    %120 = math.tanh %119 : vector<8x32xf32>
    %121 = arith.mulf %120, %116 : vector<8x32xf32>
    %c5_i32 = arith.constant 5 : i32
    %122 = arith.index_cast %c5_i32 : i32 to index
    %c0_32 = arith.constant 0 : index
    %c0_33 = arith.constant 0 : index
    %123 = vector.load %arg7[%122, %c0_32, %c0_33] : memref<16x8x128xf32, #tpu.memory_space<vmem>>, vector<1x8x128xf32>
    %124 = vector.shape_cast %123 : vector<1x8x128xf32> to vector<8x128xf32>
    %cst_34 = arith.constant dense<0.000000e+00> : vector<8x128xf32>
    %125 = tpu.matmul %121, %14, %cst_34 {dimension_numbers = #tpu.dot_dimension_numbers<[1], [0], [0], [1], [0, 0, 1, 1], [], []>} : vector<8x32xf32>, vector<32x128xf32>, vector<8x128xf32> -> vector<8x128xf32>
    %126 = arith.addf %124, %125 : vector<8x128xf32>
    %127 = math.tanh %126 : vector<8x128xf32>
    %128 = arith.negf %126 : vector<8x128xf32>
    %129 = math.exp %128 : vector<8x128xf32>
    %cst_35 = arith.constant 1.000000e+00 : f32
    %130 = vector.broadcast %cst_35 : f32 to vector<8x128xf32>
    %131 = arith.addf %130, %129 : vector<8x128xf32>
    %132 = arith.divf %130, %131 : vector<8x128xf32>
    %133 = arith.select %13, %127, %132 : vector<8x128xi1>, vector<8x128xf32>
    %134 = vector.extract_strided_slice %133 {offsets = [0, 0], sizes = [8, 32], strides = [1, 1]} : vector<8x128xf32> to vector<8x32xf32>
    %135 = vector.extract_strided_slice %133 {offsets = [0, 32], sizes = [8, 32], strides = [1, 1]} : vector<8x128xf32> to vector<8x32xf32>
    %136 = vector.extract_strided_slice %133 {offsets = [0, 64], sizes = [8, 32], strides = [1, 1]} : vector<8x128xf32> to vector<8x32xf32>
    %137 = vector.extract_strided_slice %133 {offsets = [0, 96], sizes = [8, 32], strides = [1, 1]} : vector<8x128xf32> to vector<8x32xf32>
    %138 = arith.mulf %134, %135 : vector<8x32xf32>
    %139 = arith.mulf %119, %136 : vector<8x32xf32>
    %140 = arith.addf %138, %139 : vector<8x32xf32>
    %141 = math.tanh %140 : vector<8x32xf32>
    %142 = arith.mulf %141, %137 : vector<8x32xf32>
    %c6_i32 = arith.constant 6 : i32
    %143 = arith.index_cast %c6_i32 : i32 to index
    %c0_36 = arith.constant 0 : index
    %c0_37 = arith.constant 0 : index
    %144 = vector.load %arg7[%143, %c0_36, %c0_37] : memref<16x8x128xf32, #tpu.memory_space<vmem>>, vector<1x8x128xf32>
    %145 = vector.shape_cast %144 : vector<1x8x128xf32> to vector<8x128xf32>
    %cst_38 = arith.constant dense<0.000000e+00> : vector<8x128xf32>
    %146 = tpu.matmul %142, %14, %cst_38 {dimension_numbers = #tpu.dot_dimension_numbers<[1], [0], [0], [1], [0, 0, 1, 1], [], []>} : vector<8x32xf32>, vector<32x128xf32>, vector<8x128xf32> -> vector<8x128xf32>
    %147 = arith.addf %145, %146 : vector<8x128xf32>
    %148 = math.tanh %147 : vector<8x128xf32>
    %149 = arith.negf %147 : vector<8x128xf32>
    %150 = math.exp %149 : vector<8x128xf32>
    %cst_39 = arith.constant 1.000000e+00 : f32
    %151 = vector.broadcast %cst_39 : f32 to vector<8x128xf32>
    %152 = arith.addf %151, %150 : vector<8x128xf32>
    %153 = arith.divf %151, %152 : vector<8x128xf32>
    %154 = arith.select %13, %148, %153 : vector<8x128xi1>, vector<8x128xf32>
    %155 = vector.extract_strided_slice %154 {offsets = [0, 0], sizes = [8, 32], strides = [1, 1]} : vector<8x128xf32> to vector<8x32xf32>
    %156 = vector.extract_strided_slice %154 {offsets = [0, 32], sizes = [8, 32], strides = [1, 1]} : vector<8x128xf32> to vector<8x32xf32>
    %157 = vector.extract_strided_slice %154 {offsets = [0, 64], sizes = [8, 32], strides = [1, 1]} : vector<8x128xf32> to vector<8x32xf32>
    %158 = vector.extract_strided_slice %154 {offsets = [0, 96], sizes = [8, 32], strides = [1, 1]} : vector<8x128xf32> to vector<8x32xf32>
    %159 = arith.mulf %155, %156 : vector<8x32xf32>
    %160 = arith.mulf %140, %157 : vector<8x32xf32>
    %161 = arith.addf %159, %160 : vector<8x32xf32>
    %162 = math.tanh %161 : vector<8x32xf32>
    %163 = arith.mulf %162, %158 : vector<8x32xf32>
    %c7_i32 = arith.constant 7 : i32
    %164 = arith.index_cast %c7_i32 : i32 to index
    %c0_40 = arith.constant 0 : index
    %c0_41 = arith.constant 0 : index
    %165 = vector.load %arg7[%164, %c0_40, %c0_41] : memref<16x8x128xf32, #tpu.memory_space<vmem>>, vector<1x8x128xf32>
    %166 = vector.shape_cast %165 : vector<1x8x128xf32> to vector<8x128xf32>
    %cst_42 = arith.constant dense<0.000000e+00> : vector<8x128xf32>
    %167 = tpu.matmul %163, %14, %cst_42 {dimension_numbers = #tpu.dot_dimension_numbers<[1], [0], [0], [1], [0, 0, 1, 1], [], []>} : vector<8x32xf32>, vector<32x128xf32>, vector<8x128xf32> -> vector<8x128xf32>
    %168 = arith.addf %166, %167 : vector<8x128xf32>
    %169 = math.tanh %168 : vector<8x128xf32>
    %170 = arith.negf %168 : vector<8x128xf32>
    %171 = math.exp %170 : vector<8x128xf32>
    %cst_43 = arith.constant 1.000000e+00 : f32
    %172 = vector.broadcast %cst_43 : f32 to vector<8x128xf32>
    %173 = arith.addf %172, %171 : vector<8x128xf32>
    %174 = arith.divf %172, %173 : vector<8x128xf32>
    %175 = arith.select %13, %169, %174 : vector<8x128xi1>, vector<8x128xf32>
    %176 = vector.extract_strided_slice %175 {offsets = [0, 0], sizes = [8, 32], strides = [1, 1]} : vector<8x128xf32> to vector<8x32xf32>
    %177 = vector.extract_strided_slice %175 {offsets = [0, 32], sizes = [8, 32], strides = [1, 1]} : vector<8x128xf32> to vector<8x32xf32>
    %178 = vector.extract_strided_slice %175 {offsets = [0, 64], sizes = [8, 32], strides = [1, 1]} : vector<8x128xf32> to vector<8x32xf32>
    %179 = vector.extract_strided_slice %175 {offsets = [0, 96], sizes = [8, 32], strides = [1, 1]} : vector<8x128xf32> to vector<8x32xf32>
    %180 = arith.mulf %176, %177 : vector<8x32xf32>
    %181 = arith.mulf %161, %178 : vector<8x32xf32>
    %182 = arith.addf %180, %181 : vector<8x32xf32>
    %183 = math.tanh %182 : vector<8x32xf32>
    %184 = arith.mulf %183, %179 : vector<8x32xf32>
    %c8_i32 = arith.constant 8 : i32
    %185 = arith.index_cast %c8_i32 : i32 to index
    %c0_44 = arith.constant 0 : index
    %c0_45 = arith.constant 0 : index
    %186 = vector.load %arg7[%185, %c0_44, %c0_45] : memref<16x8x128xf32, #tpu.memory_space<vmem>>, vector<1x8x128xf32>
    %187 = vector.shape_cast %186 : vector<1x8x128xf32> to vector<8x128xf32>
    %cst_46 = arith.constant dense<0.000000e+00> : vector<8x128xf32>
    %188 = tpu.matmul %184, %14, %cst_46 {dimension_numbers = #tpu.dot_dimension_numbers<[1], [0], [0], [1], [0, 0, 1, 1], [], []>} : vector<8x32xf32>, vector<32x128xf32>, vector<8x128xf32> -> vector<8x128xf32>
    %189 = arith.addf %187, %188 : vector<8x128xf32>
    %190 = math.tanh %189 : vector<8x128xf32>
    %191 = arith.negf %189 : vector<8x128xf32>
    %192 = math.exp %191 : vector<8x128xf32>
    %cst_47 = arith.constant 1.000000e+00 : f32
    %193 = vector.broadcast %cst_47 : f32 to vector<8x128xf32>
    %194 = arith.addf %193, %192 : vector<8x128xf32>
    %195 = arith.divf %193, %194 : vector<8x128xf32>
    %196 = arith.select %13, %190, %195 : vector<8x128xi1>, vector<8x128xf32>
    %197 = vector.extract_strided_slice %196 {offsets = [0, 0], sizes = [8, 32], strides = [1, 1]} : vector<8x128xf32> to vector<8x32xf32>
    %198 = vector.extract_strided_slice %196 {offsets = [0, 32], sizes = [8, 32], strides = [1, 1]} : vector<8x128xf32> to vector<8x32xf32>
    %199 = vector.extract_strided_slice %196 {offsets = [0, 64], sizes = [8, 32], strides = [1, 1]} : vector<8x128xf32> to vector<8x32xf32>
    %200 = vector.extract_strided_slice %196 {offsets = [0, 96], sizes = [8, 32], strides = [1, 1]} : vector<8x128xf32> to vector<8x32xf32>
    %201 = arith.mulf %197, %198 : vector<8x32xf32>
    %202 = arith.mulf %182, %199 : vector<8x32xf32>
    %203 = arith.addf %201, %202 : vector<8x32xf32>
    %204 = math.tanh %203 : vector<8x32xf32>
    %205 = arith.mulf %204, %200 : vector<8x32xf32>
    %c9_i32 = arith.constant 9 : i32
    %206 = arith.index_cast %c9_i32 : i32 to index
    %c0_48 = arith.constant 0 : index
    %c0_49 = arith.constant 0 : index
    %207 = vector.load %arg7[%206, %c0_48, %c0_49] : memref<16x8x128xf32, #tpu.memory_space<vmem>>, vector<1x8x128xf32>
    %208 = vector.shape_cast %207 : vector<1x8x128xf32> to vector<8x128xf32>
    %cst_50 = arith.constant dense<0.000000e+00> : vector<8x128xf32>
    %209 = tpu.matmul %205, %14, %cst_50 {dimension_numbers = #tpu.dot_dimension_numbers<[1], [0], [0], [1], [0, 0, 1, 1], [], []>} : vector<8x32xf32>, vector<32x128xf32>, vector<8x128xf32> -> vector<8x128xf32>
    %210 = arith.addf %208, %209 : vector<8x128xf32>
    %211 = math.tanh %210 : vector<8x128xf32>
    %212 = arith.negf %210 : vector<8x128xf32>
    %213 = math.exp %212 : vector<8x128xf32>
    %cst_51 = arith.constant 1.000000e+00 : f32
    %214 = vector.broadcast %cst_51 : f32 to vector<8x128xf32>
    %215 = arith.addf %214, %213 : vector<8x128xf32>
    %216 = arith.divf %214, %215 : vector<8x128xf32>
    %217 = arith.select %13, %211, %216 : vector<8x128xi1>, vector<8x128xf32>
    %218 = vector.extract_strided_slice %217 {offsets = [0, 0], sizes = [8, 32], strides = [1, 1]} : vector<8x128xf32> to vector<8x32xf32>
    %219 = vector.extract_strided_slice %217 {offsets = [0, 32], sizes = [8, 32], strides = [1, 1]} : vector<8x128xf32> to vector<8x32xf32>
    %220 = vector.extract_strided_slice %217 {offsets = [0, 64], sizes = [8, 32], strides = [1, 1]} : vector<8x128xf32> to vector<8x32xf32>
    %221 = vector.extract_strided_slice %217 {offsets = [0, 96], sizes = [8, 32], strides = [1, 1]} : vector<8x128xf32> to vector<8x32xf32>
    %222 = arith.mulf %218, %219 : vector<8x32xf32>
    %223 = arith.mulf %203, %220 : vector<8x32xf32>
    %224 = arith.addf %222, %223 : vector<8x32xf32>
    %225 = math.tanh %224 : vector<8x32xf32>
    %226 = arith.mulf %225, %221 : vector<8x32xf32>
    %c10_i32 = arith.constant 10 : i32
    %227 = arith.index_cast %c10_i32 : i32 to index
    %c0_52 = arith.constant 0 : index
    %c0_53 = arith.constant 0 : index
    %228 = vector.load %arg7[%227, %c0_52, %c0_53] : memref<16x8x128xf32, #tpu.memory_space<vmem>>, vector<1x8x128xf32>
    %229 = vector.shape_cast %228 : vector<1x8x128xf32> to vector<8x128xf32>
    %cst_54 = arith.constant dense<0.000000e+00> : vector<8x128xf32>
    %230 = tpu.matmul %226, %14, %cst_54 {dimension_numbers = #tpu.dot_dimension_numbers<[1], [0], [0], [1], [0, 0, 1, 1], [], []>} : vector<8x32xf32>, vector<32x128xf32>, vector<8x128xf32> -> vector<8x128xf32>
    %231 = arith.addf %229, %230 : vector<8x128xf32>
    %232 = math.tanh %231 : vector<8x128xf32>
    %233 = arith.negf %231 : vector<8x128xf32>
    %234 = math.exp %233 : vector<8x128xf32>
    %cst_55 = arith.constant 1.000000e+00 : f32
    %235 = vector.broadcast %cst_55 : f32 to vector<8x128xf32>
    %236 = arith.addf %235, %234 : vector<8x128xf32>
    %237 = arith.divf %235, %236 : vector<8x128xf32>
    %238 = arith.select %13, %232, %237 : vector<8x128xi1>, vector<8x128xf32>
    %239 = vector.extract_strided_slice %238 {offsets = [0, 0], sizes = [8, 32], strides = [1, 1]} : vector<8x128xf32> to vector<8x32xf32>
    %240 = vector.extract_strided_slice %238 {offsets = [0, 32], sizes = [8, 32], strides = [1, 1]} : vector<8x128xf32> to vector<8x32xf32>
    %241 = vector.extract_strided_slice %238 {offsets = [0, 64], sizes = [8, 32], strides = [1, 1]} : vector<8x128xf32> to vector<8x32xf32>
    %242 = vector.extract_strided_slice %238 {offsets = [0, 96], sizes = [8, 32], strides = [1, 1]} : vector<8x128xf32> to vector<8x32xf32>
    %243 = arith.mulf %239, %240 : vector<8x32xf32>
    %244 = arith.mulf %224, %241 : vector<8x32xf32>
    %245 = arith.addf %243, %244 : vector<8x32xf32>
    %246 = math.tanh %245 : vector<8x32xf32>
    %247 = arith.mulf %246, %242 : vector<8x32xf32>
    %c11_i32 = arith.constant 11 : i32
    %248 = arith.index_cast %c11_i32 : i32 to index
    %c0_56 = arith.constant 0 : index
    %c0_57 = arith.constant 0 : index
    %249 = vector.load %arg7[%248, %c0_56, %c0_57] : memref<16x8x128xf32, #tpu.memory_space<vmem>>, vector<1x8x128xf32>
    %250 = vector.shape_cast %249 : vector<1x8x128xf32> to vector<8x128xf32>
    %cst_58 = arith.constant dense<0.000000e+00> : vector<8x128xf32>
    %251 = tpu.matmul %247, %14, %cst_58 {dimension_numbers = #tpu.dot_dimension_numbers<[1], [0], [0], [1], [0, 0, 1, 1], [], []>} : vector<8x32xf32>, vector<32x128xf32>, vector<8x128xf32> -> vector<8x128xf32>
    %252 = arith.addf %250, %251 : vector<8x128xf32>
    %253 = math.tanh %252 : vector<8x128xf32>
    %254 = arith.negf %252 : vector<8x128xf32>
    %255 = math.exp %254 : vector<8x128xf32>
    %cst_59 = arith.constant 1.000000e+00 : f32
    %256 = vector.broadcast %cst_59 : f32 to vector<8x128xf32>
    %257 = arith.addf %256, %255 : vector<8x128xf32>
    %258 = arith.divf %256, %257 : vector<8x128xf32>
    %259 = arith.select %13, %253, %258 : vector<8x128xi1>, vector<8x128xf32>
    %260 = vector.extract_strided_slice %259 {offsets = [0, 0], sizes = [8, 32], strides = [1, 1]} : vector<8x128xf32> to vector<8x32xf32>
    %261 = vector.extract_strided_slice %259 {offsets = [0, 32], sizes = [8, 32], strides = [1, 1]} : vector<8x128xf32> to vector<8x32xf32>
    %262 = vector.extract_strided_slice %259 {offsets = [0, 64], sizes = [8, 32], strides = [1, 1]} : vector<8x128xf32> to vector<8x32xf32>
    %263 = vector.extract_strided_slice %259 {offsets = [0, 96], sizes = [8, 32], strides = [1, 1]} : vector<8x128xf32> to vector<8x32xf32>
    %264 = arith.mulf %260, %261 : vector<8x32xf32>
    %265 = arith.mulf %245, %262 : vector<8x32xf32>
    %266 = arith.addf %264, %265 : vector<8x32xf32>
    %267 = math.tanh %266 : vector<8x32xf32>
    %268 = arith.mulf %267, %263 : vector<8x32xf32>
    %c12_i32 = arith.constant 12 : i32
    %269 = arith.index_cast %c12_i32 : i32 to index
    %c0_60 = arith.constant 0 : index
    %c0_61 = arith.constant 0 : index
    %270 = vector.load %arg7[%269, %c0_60, %c0_61] : memref<16x8x128xf32, #tpu.memory_space<vmem>>, vector<1x8x128xf32>
    %271 = vector.shape_cast %270 : vector<1x8x128xf32> to vector<8x128xf32>
    %cst_62 = arith.constant dense<0.000000e+00> : vector<8x128xf32>
    %272 = tpu.matmul %268, %14, %cst_62 {dimension_numbers = #tpu.dot_dimension_numbers<[1], [0], [0], [1], [0, 0, 1, 1], [], []>} : vector<8x32xf32>, vector<32x128xf32>, vector<8x128xf32> -> vector<8x128xf32>
    %273 = arith.addf %271, %272 : vector<8x128xf32>
    %274 = math.tanh %273 : vector<8x128xf32>
    %275 = arith.negf %273 : vector<8x128xf32>
    %276 = math.exp %275 : vector<8x128xf32>
    %cst_63 = arith.constant 1.000000e+00 : f32
    %277 = vector.broadcast %cst_63 : f32 to vector<8x128xf32>
    %278 = arith.addf %277, %276 : vector<8x128xf32>
    %279 = arith.divf %277, %278 : vector<8x128xf32>
    %280 = arith.select %13, %274, %279 : vector<8x128xi1>, vector<8x128xf32>
    %281 = vector.extract_strided_slice %280 {offsets = [0, 0], sizes = [8, 32], strides = [1, 1]} : vector<8x128xf32> to vector<8x32xf32>
    %282 = vector.extract_strided_slice %280 {offsets = [0, 32], sizes = [8, 32], strides = [1, 1]} : vector<8x128xf32> to vector<8x32xf32>
    %283 = vector.extract_strided_slice %280 {offsets = [0, 64], sizes = [8, 32], strides = [1, 1]} : vector<8x128xf32> to vector<8x32xf32>
    %284 = vector.extract_strided_slice %280 {offsets = [0, 96], sizes = [8, 32], strides = [1, 1]} : vector<8x128xf32> to vector<8x32xf32>
    %285 = arith.mulf %281, %282 : vector<8x32xf32>
    %286 = arith.mulf %266, %283 : vector<8x32xf32>
    %287 = arith.addf %285, %286 : vector<8x32xf32>
    %288 = math.tanh %287 : vector<8x32xf32>
    %289 = arith.mulf %288, %284 : vector<8x32xf32>
    %c13_i32 = arith.constant 13 : i32
    %290 = arith.index_cast %c13_i32 : i32 to index
    %c0_64 = arith.constant 0 : index
    %c0_65 = arith.constant 0 : index
    %291 = vector.load %arg7[%290, %c0_64, %c0_65] : memref<16x8x128xf32, #tpu.memory_space<vmem>>, vector<1x8x128xf32>
    %292 = vector.shape_cast %291 : vector<1x8x128xf32> to vector<8x128xf32>
    %cst_66 = arith.constant dense<0.000000e+00> : vector<8x128xf32>
    %293 = tpu.matmul %289, %14, %cst_66 {dimension_numbers = #tpu.dot_dimension_numbers<[1], [0], [0], [1], [0, 0, 1, 1], [], []>} : vector<8x32xf32>, vector<32x128xf32>, vector<8x128xf32> -> vector<8x128xf32>
    %294 = arith.addf %292, %293 : vector<8x128xf32>
    %295 = math.tanh %294 : vector<8x128xf32>
    %296 = arith.negf %294 : vector<8x128xf32>
    %297 = math.exp %296 : vector<8x128xf32>
    %cst_67 = arith.constant 1.000000e+00 : f32
    %298 = vector.broadcast %cst_67 : f32 to vector<8x128xf32>
    %299 = arith.addf %298, %297 : vector<8x128xf32>
    %300 = arith.divf %298, %299 : vector<8x128xf32>
    %301 = arith.select %13, %295, %300 : vector<8x128xi1>, vector<8x128xf32>
    %302 = vector.extract_strided_slice %301 {offsets = [0, 0], sizes = [8, 32], strides = [1, 1]} : vector<8x128xf32> to vector<8x32xf32>
    %303 = vector.extract_strided_slice %301 {offsets = [0, 32], sizes = [8, 32], strides = [1, 1]} : vector<8x128xf32> to vector<8x32xf32>
    %304 = vector.extract_strided_slice %301 {offsets = [0, 64], sizes = [8, 32], strides = [1, 1]} : vector<8x128xf32> to vector<8x32xf32>
    %305 = vector.extract_strided_slice %301 {offsets = [0, 96], sizes = [8, 32], strides = [1, 1]} : vector<8x128xf32> to vector<8x32xf32>
    %306 = arith.mulf %302, %303 : vector<8x32xf32>
    %307 = arith.mulf %287, %304 : vector<8x32xf32>
    %308 = arith.addf %306, %307 : vector<8x32xf32>
    %309 = math.tanh %308 : vector<8x32xf32>
    %310 = arith.mulf %309, %305 : vector<8x32xf32>
    %c14_i32 = arith.constant 14 : i32
    %311 = arith.index_cast %c14_i32 : i32 to index
    %c0_68 = arith.constant 0 : index
    %c0_69 = arith.constant 0 : index
    %312 = vector.load %arg7[%311, %c0_68, %c0_69] : memref<16x8x128xf32, #tpu.memory_space<vmem>>, vector<1x8x128xf32>
    %313 = vector.shape_cast %312 : vector<1x8x128xf32> to vector<8x128xf32>
    %cst_70 = arith.constant dense<0.000000e+00> : vector<8x128xf32>
    %314 = tpu.matmul %310, %14, %cst_70 {dimension_numbers = #tpu.dot_dimension_numbers<[1], [0], [0], [1], [0, 0, 1, 1], [], []>} : vector<8x32xf32>, vector<32x128xf32>, vector<8x128xf32> -> vector<8x128xf32>
    %315 = arith.addf %313, %314 : vector<8x128xf32>
    %316 = math.tanh %315 : vector<8x128xf32>
    %317 = arith.negf %315 : vector<8x128xf32>
    %318 = math.exp %317 : vector<8x128xf32>
    %cst_71 = arith.constant 1.000000e+00 : f32
    %319 = vector.broadcast %cst_71 : f32 to vector<8x128xf32>
    %320 = arith.addf %319, %318 : vector<8x128xf32>
    %321 = arith.divf %319, %320 : vector<8x128xf32>
    %322 = arith.select %13, %316, %321 : vector<8x128xi1>, vector<8x128xf32>
    %323 = vector.extract_strided_slice %322 {offsets = [0, 0], sizes = [8, 32], strides = [1, 1]} : vector<8x128xf32> to vector<8x32xf32>
    %324 = vector.extract_strided_slice %322 {offsets = [0, 32], sizes = [8, 32], strides = [1, 1]} : vector<8x128xf32> to vector<8x32xf32>
    %325 = vector.extract_strided_slice %322 {offsets = [0, 64], sizes = [8, 32], strides = [1, 1]} : vector<8x128xf32> to vector<8x32xf32>
    %326 = vector.extract_strided_slice %322 {offsets = [0, 96], sizes = [8, 32], strides = [1, 1]} : vector<8x128xf32> to vector<8x32xf32>
    %327 = arith.mulf %323, %324 : vector<8x32xf32>
    %328 = arith.mulf %308, %325 : vector<8x32xf32>
    %329 = arith.addf %327, %328 : vector<8x32xf32>
    %330 = math.tanh %329 : vector<8x32xf32>
    %331 = arith.mulf %330, %326 : vector<8x32xf32>
    %c15_i32 = arith.constant 15 : i32
    %332 = arith.index_cast %c15_i32 : i32 to index
    %c0_72 = arith.constant 0 : index
    %c0_73 = arith.constant 0 : index
    %333 = vector.load %arg7[%332, %c0_72, %c0_73] : memref<16x8x128xf32, #tpu.memory_space<vmem>>, vector<1x8x128xf32>
    %334 = vector.shape_cast %333 : vector<1x8x128xf32> to vector<8x128xf32>
    %cst_74 = arith.constant dense<0.000000e+00> : vector<8x128xf32>
    %335 = tpu.matmul %331, %14, %cst_74 {dimension_numbers = #tpu.dot_dimension_numbers<[1], [0], [0], [1], [0, 0, 1, 1], [], []>} : vector<8x32xf32>, vector<32x128xf32>, vector<8x128xf32> -> vector<8x128xf32>
    %336 = arith.addf %334, %335 : vector<8x128xf32>
    %337 = math.tanh %336 : vector<8x128xf32>
    %338 = arith.negf %336 : vector<8x128xf32>
    %339 = math.exp %338 : vector<8x128xf32>
    %cst_75 = arith.constant 1.000000e+00 : f32
    %340 = vector.broadcast %cst_75 : f32 to vector<8x128xf32>
    %341 = arith.addf %340, %339 : vector<8x128xf32>
    %342 = arith.divf %340, %341 : vector<8x128xf32>
    %343 = arith.select %13, %337, %342 : vector<8x128xi1>, vector<8x128xf32>
    %344 = vector.extract_strided_slice %343 {offsets = [0, 0], sizes = [8, 32], strides = [1, 1]} : vector<8x128xf32> to vector<8x32xf32>
    %345 = vector.extract_strided_slice %343 {offsets = [0, 32], sizes = [8, 32], strides = [1, 1]} : vector<8x128xf32> to vector<8x32xf32>
    %346 = vector.extract_strided_slice %343 {offsets = [0, 64], sizes = [8, 32], strides = [1, 1]} : vector<8x128xf32> to vector<8x32xf32>
    %347 = vector.extract_strided_slice %343 {offsets = [0, 96], sizes = [8, 32], strides = [1, 1]} : vector<8x128xf32> to vector<8x32xf32>
    %348 = arith.mulf %344, %345 : vector<8x32xf32>
    %349 = arith.mulf %329, %346 : vector<8x32xf32>
    %350 = arith.addf %348, %349 : vector<8x32xf32>
    %351 = math.tanh %350 : vector<8x32xf32>
    %352 = arith.mulf %351, %347 : vector<8x32xf32>
    %c16_i32 = arith.constant 16 : i32
    %c0_76 = arith.constant 0 : index
    %c0_77 = arith.constant 0 : index
    %353 = vector.load %arg4[%c0_76, %c0_77] : memref<32x10xf32, #tpu.memory_space<vmem>>, vector<32x10xf32>
    %cst_78 = arith.constant dense<0.000000e+00> : vector<8x10xf32>
    %354 = tpu.matmul %352, %353, %cst_78 {dimension_numbers = #tpu.dot_dimension_numbers<[1], [0], [0], [1], [0, 0, 1, 1], [], []>} : vector<8x32xf32>, vector<32x10xf32>, vector<8x10xf32> -> vector<8x10xf32>
    %c0_79 = arith.constant 0 : index
    %c0_80 = arith.constant 0 : index
    %355 = vector.load %arg5[%c0_79, %c0_80] : memref<8x1xf32, #tpu.memory_space<vmem>>, vector<8x1xf32>
    %356 = vector.broadcast %355 : vector<8x1xf32> to vector<8x10xf32>
    %357 = arith.addf %354, %356 : vector<8x10xf32>
    %cst_81 = arith.constant dense<0xFF800000> : vector<10xf32>
    %358 = vector.multi_reduction <maximumf>, %357, %cst_81 [0] : vector<8x10xf32> to vector<10xf32>
    %359 = vector.shape_cast %358 : vector<10xf32> to vector<1x10xf32>
    %360 = vector.broadcast %359 : vector<1x10xf32> to vector<8x10xf32>
    %361 = arith.subf %357, %360 : vector<8x10xf32>
    %362 = math.exp %361 : vector<8x10xf32>
    %cst_82 = arith.constant dense<0.000000e+00> : vector<10xf32>
    %363 = vector.multi_reduction <add>, %362, %cst_82 [0] : vector<8x10xf32> to vector<10xf32>
    %364 = vector.shape_cast %363 : vector<10xf32> to vector<1x10xf32>
    %365 = vector.broadcast %364 : vector<1x10xf32> to vector<8x10xf32>
    %366 = arith.divf %362, %365 : vector<8x10xf32>
    %c0_83 = arith.constant 0 : index
    %c0_84 = arith.constant 0 : index
    %367 = vector.load %arg6[%c0_83, %c0_84] : memref<8x10xf32, #tpu.memory_space<vmem>>, vector<8x10xf32>
    tpu.vector_store %arg6[%c0_83, %c0_84], %366 {strides = array<i32>} : memref<8x10xf32, #tpu.memory_space<vmem>>, vector<8x10xf32>,
    return
  }
}

</mosaic_0001>

<bundles_post_ra>
// kernel: tpu_custom_call.1
= control target key start
LH: loop header
LB: loop body
LE: loop exit
PB: predicated region body
PF: predicated region fallthrough
CT: control target
= control target key end

     0   :  { %v1458_v2 = vmov 0   ;;  %s1803_s0 = inlined_call_operand.vmem [shape: f32[16,8,1], index: 0, kind: input, shape index: {}]   ;;  %s1804_s1 = inlined_call_operand.vmem [shape: f32[1,128], index: 1, kind: input, shape index: {}]   ;;  %s1805_s2 = inlined_call_operand.vmem [shape: f32[32,128], index: 2, kind: input, shape index: {}]   ;;  %s1806_s3 = inlined_call_operand.vmem [shape: f32[8,128], index: 3, kind: input, shape index: {}]   ;;  %s1807_s4 = inlined_call_operand.vmem [shape: f32[32,10], index: 4, kind: input, shape index: {}]   ;;  %s1808_s5 = inlined_call_operand.vmem [shape: f32[8,1], index: 5, kind: input, shape index: {}]   ;;  %s1809_s6 = inlined_call_operand.hbm [shape: f32[8,10], index: 6, kind: output, shape index: {}]  }
   0x1   :  { %v1502_v0 = vld [vmem:[%s1805_s2 + $0x18] sm:$0xff]  ;;  %v1507_v1 = vld [vmem:[%s1805_s2 + $0x10] sm:$0xff]  ;;  %1294 = vset.pattern.permute.xlu0 %v1458_v2  ;;  %v24_v3 = vld [vmem:[%s1803_s0] sm:$0xff] }
   0x2   :  { %197 = vmatpush.msra.mxu0 %v1502_v0  ;;  %v1516_v4 = vld [vmem:[%s1805_s2 + $0x8] sm:$0xff]  ;;  %43 = vperm.xlu0 %1294, %v24_v3  }
   0x3   :  { %260 = vmatpush.msra.mxu1 %v1502_v0 }
   0x4   :  { %11 = vsyncpa [#allocation4], 0  ;;  %198 = vmatpush.msra.mxu0 %v1507_v1  ;;  %1295 = vset.pattern.permute.xlu2 %v1458_v2  ;;  %v1523_v5 = vld [vmem:[%s1805_s2] sm:$0xff]  ;;  %v1459_v6 = vmov 0.0   ;;  %v173_v18 = vlaneseq  ;;  %s1460_s10 = smov 96   ;;  %s1461_s11 = smov 64  }
   0x5   :  { %261 = vmatpush.msra.mxu1 %v1507_v1  ;;  %322 = vmatpush.msra.mxu2 %v1502_v0  ;;  %v1561_v7 = vld [vmem:[%s1804_s1] ss:$0 sm:$0xff]  ;;  %s1462_s12 = smov 32   ;;  %v25_v32 = vld [vmem:[%s1803_s0 + $0x8] sm:$0xff]  ;;  %vm181_vm5 = vcmask 261120   ;;  %v26_v60 = vld [vmem:[%s1803_s0 + $0x10] sm:$0xff] }
   0x6   :  { %199 = vmatpush.msra.mxu0 %v1516_v4  ;;  %384 = vmatpush.msra.mxu3 %v1502_v0  ;;  %v1567_v10 = vld [vmem:[%s1806_s3] sm:$0xff]  ;;  %v1570_v21 = vand.u32 127, %v173_v18  ;;  %s1247_s2 = sshll.u32 %s1809_s6, 4  ;;  %s1248_s2 = int_to_ptr.hbm [resolvable:$true] %s1247_s2 }
   0x7   :  { %262 = vmatpush.msra.mxu1 %v1516_v4  ;;  %323 = vmatpush.msra.mxu2 %v1507_v1 }
   0x8   :  { %200 = vmatpush.msra.mxu0 %v1523_v5  ;;  %385 = vmatpush.msra.mxu3 %v1507_v1  ;;  %vm175_vm2 = vcmp.lt.s32.totalorder %v1570_v21, 32  ;;  %v1175_v21 = vld [vmem:[%s1807_s4 + $0x10] sm:$0xff] }
   0x9   :  { %201 = vmatmul.f32.vlgmr.msra.gmra.mxu0 %v1459_v6  ;;  %263 = vmatpush.msra.mxu1 %v1523_v5 }
   0xa   :  { %324 = vmatpush.msra.mxu2 %v1516_v4  ;;  %386 = vmatpush.msra.mxu3 %v1516_v4 }
   0xb   :  { %446 = vmatpush.msrb.mxu0 %v1502_v0  ;;  %1296 = vset.pattern.permute.xlu1 %v1458_v2 }
   0xc   :  { %325 = vmatpush.msra.mxu2 %v1523_v5  ;;  %387 = vmatpush.msra.mxu3 %v1523_v5 }
   0xd   :  { %447 = vmatpush.msrb.mxu0 %v1507_v1  ;;  %508 = vmatpush.msrb.mxu1 %v1502_v0 }
   0xe   :  { %570 = vmatpush.msrb.mxu2 %v1502_v0  ;;  %632 = vmatpush.msrb.mxu3 %v1502_v0 }
   0xf   :  { %448 = vmatpush.msrb.mxu0 %v1516_v4  ;;  %509 = vmatpush.msrb.mxu1 %v1507_v1 }
  0x10   :  { %571 = vmatpush.msrb.mxu2 %v1507_v1  ;;  %633 = vmatpush.msrb.mxu3 %v1507_v1 }
  0x11   :  { %449 = vmatpush.msrb.mxu0 %v1523_v5  ;;  %510 = vmatpush.msrb.mxu1 %v1516_v4 }
  0x12   :  { %572 = vmatpush.msrb.mxu2 %v1516_v4  ;;  %634 = vmatpush.msrb.mxu3 %v1516_v4 }
  0x13   :  { %511 = vmatpush.msrb.mxu1 %v1523_v5  ;;  %694 = vmatpush.msra.mxu0 %v1502_v0 }
  0x14   :  { %573 = vmatpush.msrb.mxu2 %v1523_v5  ;;  %635 = vmatpush.msrb.mxu3 %v1523_v5 }
  0x15   :  { %695 = vmatpush.msra.mxu0 %v1507_v1  ;;  %48 = vperm.xlu2 %1295, %v25_v32   ;;  %v27_v32 = vld [vmem:[%s1803_s0 + $0x18] sm:$0xff] }
  0x17   :  { %696 = vmatpush.msra.mxu0 %v1516_v4 }
  0x19   :  { %697 = vmatpush.msra.mxu0 %v1523_v5 }
  0x6f   :  { %v49_v40 = vpop.permute.xlu2 %48 }
  0x70   :  { %v125_v41 = vmul.f32 %v1561_v7, %v49_v40 }
  0x72   :  { %v142_v42 = vadd.f32 %v1567_v10, %v125_v41 }
  0x74   :  { %v44_v8 = vpop.permute.xlu0 %43 }
  0x75   :  { %v124_v9 = vmul.f32 %v1561_v7, %v44_v8 }
  0x77   :  { %v141_v11 = vadd.f32 %v1567_v10, %v124_v9 }
  0x86   :  { %v202_v12 = vpop.f32.mrf.mxu0 }
  0x87   :  { %v205_v13 = vadd.f32 %v202_v12, %v141_v11 }
  0x89   :  { %v1256_v14 = vmul.f32 -1.442695, %v205_v13 }
  0x8b   :  { %1298 = vpow2.f32 %v1256_v14 }
  0x91   :  { %v1299_v15 = vpop.eup %1298 }
  0x92   :  { %v210_v16 = vadd.f32 1.0, %v1299_v15 }
  0x94   :  { %1300 = vrcp.f32 %v210_v16  ;;  %v222_v22 = vand.u32 2147483648, %v210_v16  ;;  %v220_v24 = vand.u32 2147483647, %v210_v16  ;;  %vm216_vm1 = vweird.f32 %v210_v16 }
  0x95   :  { %1302 = vtanh.f32 %v205_v13 }
  0x96   :  { %v223_v26 = vor.u32 1.1754944e-38, %v222_v22  ;;  %vm221_vm4 = vcmp.eq.f32.partialorder %v220_v24, 8.507059e+37 }
  0x9a   :  { %v1301_v17 = vpop.eup %1300 }
  0x9b   :  { %v212_v19 = vmul.f32 %v1301_v17, %v210_v16  ;;  %vm217_vm0 = vweird.f32 %v1301_v17  ;;  %v1303_v28 = vpop.eup %1302 }
  0x9c   :  { %vm218_vm3 = vmor %vm216_vm1, %vm217_vm0 }
  0x9d   :  { %v213_v20 = vsub.f32 1.0, %v212_v19 }
  0x9f   :  { %v214_v23 = vmul.f32 %v1301_v17, %v213_v20 }
  0xa1   :  { %v215_v25 = vadd.f32 %v1301_v17, %v214_v23 }
  0xa3   :  { %v219_v27 = vsel %vm218_vm3, %v1301_v17, %v215_v25 }
  0xa4   :  { %v224_v29 = vsel %vm221_vm4, %v223_v26, %v219_v27 }
  0xa5   :  { %v226_v30 = vsel %vm175_vm2, %v1303_v28, %v224_v29 }
  0xa6   :  { %228 = vrot.lane.b32.xlu0 %v226_v30, %s1460_s10  ;;  %v232_v31 = vmul.f32 0.0, %v226_v30 }
  0xa8   :  { %234 = vrot.lane.b32.xlu1 %v232_v31, %s1461_s11 }
  0xb0   :  { %239 = vrot.lane.b32.xlu1 %v226_v30, %s1462_s12 }
 0x118   :  { %v229_v33 = vpop.permute.xlu0 %228 }
 0x119   :  { %v231_v34 = vmul.f32 %v229_v33, %v226_v30 }
 0x11a   :  { %v235_v35 = vpop.permute.xlu1 %234 }
 0x11b   :  { %v237_v36 = vadd.f32 %v235_v35, %v231_v34 }
 0x11d   :  { %1304 = vtanh.f32 %v237_v36 }
 0x122   :  { %v240_v37 = vpop.permute.xlu1 %239 }
 0x123   :  { %v1305_v38 = vpop.eup %1304 }
 0x124   :  { %v242_v39 = vmul.f32 %v1305_v38, %v240_v37 }
 0x126   :  { %1257 = vmatmul.msk.f32.vlgmr.msra.gmra.mxu1 %vm181_vm5, %v242_v39 }
 0x127   :  { %756 = vmatpush.msra.mxu1 %v1502_v0 }
 0x129   :  { %757 = vmatpush.msra.mxu1 %v1507_v1 }
 0x12b   :  { %758 = vmatpush.msra.mxu1 %v1516_v4 }
 0x12d   :  { %759 = vmatpush.msra.mxu1 %v1523_v5 }
 0x1a3   :  { %v265_v43 = vpop.f32.mrf.mxu1 }
 0x1a4   :  { %v268_v44 = vadd.f32 %v265_v43, %v142_v42 }
 0x1a6   :  { %v1258_v45 = vmul.f32 -1.442695, %v268_v44 }
 0x1a8   :  { %1306 = vpow2.f32 %v1258_v45 }
 0x1ae   :  { %v1307_v46 = vpop.eup %1306 }
 0x1af   :  { %v273_v47 = vadd.f32 1.0, %v1307_v46 }
 0x1b1   :  { %1308 = vrcp.f32 %v273_v47  ;;  %v285_v51 = vand.u32 2147483648, %v273_v47  ;;  %v283_v53 = vand.u32 2147483647, %v273_v47  ;;  %vm279_vm7 = vweird.f32 %v273_v47 }
 0x1b2   :  { %1310 = vtanh.f32 %v268_v44 }
 0x1b3   :  { %v286_v55 = vor.u32 1.1754944e-38, %v285_v51  ;;  %vm284_vm9 = vcmp.eq.f32.partialorder %v283_v53, 8.507059e+37 }
 0x1b7   :  { %v1309_v48 = vpop.eup %1308 }
 0x1b8   :  { %v275_v49 = vmul.f32 %v1309_v48, %v273_v47  ;;  %vm280_vm6 = vweird.f32 %v1309_v48  ;;  %v1311_v57 = vpop.eup %1310 }
 0x1b9   :  { %vm281_vm8 = vmor %vm279_vm7, %vm280_vm6 }
 0x1ba   :  { %v276_v50 = vsub.f32 1.0, %v275_v49 }
 0x1bc   :  { %v277_v52 = vmul.f32 %v1309_v48, %v276_v50 }
 0x1be   :  { %v278_v54 = vadd.f32 %v1309_v48, %v277_v52 }
 0x1c0   :  { %v282_v56 = vsel %vm281_vm8, %v1309_v48, %v278_v54 }
 0x1c1   :  { %v287_v58 = vsel %vm284_vm9, %v286_v55, %v282_v56 }
 0x1c2   :  { %v289_v59 = vsel %vm175_vm2, %v1311_v57, %v287_v58 }
 0x1c3   :  { %301 = vrot.lane.b32.xlu1 %v289_v59, %s1462_s12  ;;  %295 = vrot.lane.b32.xlu0 %v289_v59, %s1461_s11 }
 0x1c4   :  { %291 = vrot.lane.b32.xlu2 %v289_v59, %s1460_s10 }
 0x1cc   :  { %53 = vperm.xlu2 %1295, %v26_v60  }
 0x21e   :  { %v292_v61 = vpop.permute.xlu2 %291 }
 0x21f   :  { %v294_v63 = vmul.f32 %v292_v61, %v289_v59  ;;  %v28_v61 = vld [vmem:[%s1803_s0 + $0x20] sm:$0xff] }
 0x226   :  { %v54_v11 = vpop.permute.xlu2 %53 }
 0x227   :  { %v126_v12 = vmul.f32 %v1561_v7, %v54_v11 }
 0x229   :  { %v143_v13 = vadd.f32 %v1567_v10, %v126_v12 }
 0x235   :  { %v296_v62 = vpop.permute.xlu0 %295  ;;  %v302_v8 = vpop.permute.xlu1 %301 }
 0x236   :  { %v298_v2 = vmul.f32 %v296_v62, %v237_v36 }
 0x238   :  { %v299_v3 = vadd.f32 %v298_v2, %v294_v63 }
 0x23a   :  { %1312 = vtanh.f32 %v299_v3 }
 0x240   :  { %v1313_v6 = vpop.eup %1312 }
 0x241   :  { %v304_v9 = vmul.f32 %v1313_v6, %v302_v8 }
 0x243   :  { %1259 = vmatmul.msk.f32.vlgmr.msra.gmra.mxu2 %vm181_vm5, %v304_v9 }
 0x244   :  { %818 = vmatpush.msra.mxu2 %v1502_v0 }
 0x246   :  { %819 = vmatpush.msra.mxu2 %v1507_v1 }
 0x248   :  { %820 = vmatpush.msra.mxu2 %v1516_v4 }
 0x24a   :  { %821 = vmatpush.msra.mxu2 %v1523_v5 }
 0x2c6   :  { %v327_v14 = vpop.f32.mrf.mxu2 }
 0x2c7   :  { %v330_v15 = vadd.f32 %v327_v14, %v143_v13 }
 0x2c9   :  { %v1260_v16 = vmul.f32 -1.442695, %v330_v15 }
 0x2cb   :  { %1314 = vpow2.f32 %v1260_v16 }
 0x2d1   :  { %v1315_v17 = vpop.eup %1314 }
 0x2d2   :  { %v335_v18 = vadd.f32 1.0, %v1315_v17 }
 0x2d4   :  { %1316 = vrcp.f32 %v335_v18  ;;  %v347_v23 = vand.u32 2147483648, %v335_v18  ;;  %v345_v25 = vand.u32 2147483647, %v335_v18  ;;  %vm341_vm11 = vweird.f32 %v335_v18 }
 0x2d5   :  { %1318 = vtanh.f32 %v330_v15 }
 0x2d6   :  { %v348_v27 = vor.u32 1.1754944e-38, %v347_v23  ;;  %vm346_vm13 = vcmp.eq.f32.partialorder %v345_v25, 8.507059e+37 }
 0x2da   :  { %v1317_v19 = vpop.eup %1316 }
 0x2db   :  { %v337_v20 = vmul.f32 %v1317_v19, %v335_v18  ;;  %vm342_vm10 = vweird.f32 %v1317_v19  ;;  %v1319_v29 = vpop.eup %1318 }
 0x2dc   :  { %vm343_vm12 = vmor %vm341_vm11, %vm342_vm10 }
 0x2dd   :  { %v338_v22 = vsub.f32 1.0, %v337_v20 }
 0x2df   :  { %v339_v24 = vmul.f32 %v1317_v19, %v338_v22 }
 0x2e1   :  { %v340_v26 = vadd.f32 %v1317_v19, %v339_v24 }
 0x2e3   :  { %v344_v28 = vsel %vm343_vm12, %v1317_v19, %v340_v26 }
 0x2e4   :  { %v349_v30 = vsel %vm346_vm13, %v348_v27, %v344_v28 }
 0x2e5   :  { %v351_v31 = vsel %vm175_vm2, %v1319_v29, %v349_v30 }
 0x2e6   :  { %363 = vrot.lane.b32.xlu2 %v351_v31, %s1462_s12  ;;  %357 = vrot.lane.b32.xlu1 %v351_v31, %s1461_s11 }
 0x2e7   :  { %353 = vrot.lane.b32.xlu0 %v351_v31, %s1460_s10 }
 0x2ef   :  { %58 = vperm.xlu0 %1294, %v27_v32  }
 0x340   :  { %v364_v39 = vpop.permute.xlu2 %363 }
 0x358   :  { %v358_v33 = vpop.permute.xlu1 %357 }
 0x359   :  { %v360_v34 = vmul.f32 %v358_v33, %v299_v3  ;;  %v354_v35 = vpop.permute.xlu0 %353  ;;  %v29_v33 = vld [vmem:[%s1803_s0 + $0x28] sm:$0xff] }
 0x35a   :  { %v356_v36 = vmul.f32 %v354_v35, %v351_v31 }
 0x35c   :  { %v361_v37 = vadd.f32 %v360_v34, %v356_v36 }
 0x35e   :  { %1320 = vtanh.f32 %v361_v37 }
 0x361   :  { %v59_v41 = vpop.permute.xlu0 %58 }
 0x362   :  { %v127_v42 = vmul.f32 %v1561_v7, %v59_v41 }
 0x364   :  { %v1321_v38 = vpop.eup %1320  ;;  %v144_v43 = vadd.f32 %v1567_v10, %v127_v42 }
 0x365   :  { %v366_v40 = vmul.f32 %v1321_v38, %v364_v39 }
 0x367   :  { %1261 = vmatmul.msk.f32.vlgmr.msra.gmra.mxu3 %vm181_vm5, %v366_v40 }
 0x368   :  { %880 = vmatpush.msra.mxu3 %v1502_v0 }
 0x36a   :  { %881 = vmatpush.msra.mxu3 %v1507_v1 }
 0x36c   :  { %882 = vmatpush.msra.mxu3 %v1516_v4 }
 0x36e   :  { %883 = vmatpush.msra.mxu3 %v1523_v5 }
 0x3ea   :  { %v389_v44 = vpop.f32.mrf.mxu3 }
 0x3eb   :  { %v392_v45 = vadd.f32 %v389_v44, %v144_v43 }
 0x3ed   :  { %v1262_v46 = vmul.f32 -1.442695, %v392_v45 }
 0x3ef   :  { %1322 = vpow2.f32 %v1262_v46 }
 0x3f5   :  { %v1323_v47 = vpop.eup %1322 }
 0x3f6   :  { %v397_v48 = vadd.f32 1.0, %v1323_v47 }
 0x3f8   :  { %1324 = vrcp.f32 %v397_v48  ;;  %v409_v52 = vand.u32 2147483648, %v397_v48  ;;  %v407_v54 = vand.u32 2147483647, %v397_v48  ;;  %vm403_vm15 = vweird.f32 %v397_v48 }
 0x3f9   :  { %1326 = vtanh.f32 %v392_v45 }
 0x3fa   :  { %v410_v56 = vor.u32 1.1754944e-38, %v409_v52  ;;  %vm408_vm1 = vcmp.eq.f32.partialorder %v407_v54, 8.507059e+37 }
 0x3fe   :  { %v1325_v49 = vpop.eup %1324 }
 0x3ff   :  { %v399_v50 = vmul.f32 %v1325_v49, %v397_v48  ;;  %vm404_vm14 = vweird.f32 %v1325_v49  ;;  %v1327_v58 = vpop.eup %1326 }
 0x400   :  { %vm405_vm0 = vmor %vm403_vm15, %vm404_vm14 }
 0x401   :  { %v400_v51 = vsub.f32 1.0, %v399_v50 }
 0x403   :  { %v401_v53 = vmul.f32 %v1325_v49, %v400_v51 }
 0x405   :  { %v402_v55 = vadd.f32 %v1325_v49, %v401_v53 }
 0x407   :  { %v406_v57 = vsel %vm405_vm0, %v1325_v49, %v402_v55 }
 0x408   :  { %v411_v59 = vsel %vm408_vm1, %v410_v56, %v406_v57 }
 0x409   :  { %v413_v60 = vsel %vm175_vm2, %v1327_v58, %v411_v59 }
 0x40a   :  { %425 = vrot.lane.b32.xlu0 %v413_v60, %s1462_s12  ;;  %419 = vrot.lane.b32.xlu2 %v413_v60, %s1461_s11 }
 0x40b   :  { %415 = vrot.lane.b32.xlu1 %v413_v60, %s1460_s10 }
 0x413   :  { %63 = vperm.xlu1 %1296, %v28_v61  }
 0x464   :  { %v420_v62 = vpop.permute.xlu2 %419 }
 0x465   :  { %v422_v2 = vmul.f32 %v420_v62, %v361_v37  ;;  %v30_v62 = vld [vmem:[%s1803_s0 + $0x30] sm:$0xff] }
 0x47c   :  { %v426_v9 = vpop.permute.xlu0 %425 }
 0x47d   :  { %v416_v63 = vpop.permute.xlu1 %415 }
 0x47e   :  { %v418_v3 = vmul.f32 %v416_v63, %v413_v60 }
 0x480   :  { %v423_v6 = vadd.f32 %v422_v2, %v418_v3 }
 0x482   :  { %1328 = vtanh.f32 %v423_v6 }
 0x485   :  { %v64_v12 = vpop.permute.xlu1 %63 }
 0x486   :  { %v128_v13 = vmul.f32 %v1561_v7, %v64_v12 }
 0x488   :  { %v1329_v8 = vpop.eup %1328  ;;  %v145_v14 = vadd.f32 %v1567_v10, %v128_v13 }
 0x489   :  { %v428_v11 = vmul.f32 %v1329_v8, %v426_v9 }
 0x48b   :  { %1263 = vmatmul.msk.f32.vlgmr.msrb.gmra.mxu0 %vm181_vm5, %v428_v11 }
 0x48c   :  { %942 = vmatpush.msrb.mxu0 %v1502_v0 }
 0x48e   :  { %943 = vmatpush.msrb.mxu0 %v1507_v1 }
 0x490   :  { %944 = vmatpush.msrb.mxu0 %v1516_v4 }
 0x492   :  { %945 = vmatpush.msrb.mxu0 %v1523_v5 }
 0x508   :  { %v451_v15 = vpop.f32.mrf.mxu0 }
 0x509   :  { %v454_v16 = vadd.f32 %v451_v15, %v145_v14 }
 0x50b   :  { %v1264_v17 = vmul.f32 -1.442695, %v454_v16 }
 0x50d   :  { %1330 = vpow2.f32 %v1264_v17 }
 0x513   :  { %v1331_v18 = vpop.eup %1330 }
 0x514   :  { %v459_v19 = vadd.f32 1.0, %v1331_v18 }
 0x516   :  { %1332 = vrcp.f32 %v459_v19  ;;  %v471_v24 = vand.u32 2147483648, %v459_v19  ;;  %v469_v26 = vand.u32 2147483647, %v459_v19  ;;  %vm465_vm4 = vweird.f32 %v459_v19 }
 0x517   :  { %1334 = vtanh.f32 %v454_v16 }
 0x518   :  { %v472_v28 = vor.u32 1.1754944e-38, %v471_v24  ;;  %vm470_vm7 = vcmp.eq.f32.partialorder %v469_v26, 8.507059e+37 }
 0x51c   :  { %v1333_v20 = vpop.eup %1332 }
 0x51d   :  { %v461_v22 = vmul.f32 %v1333_v20, %v459_v19  ;;  %vm466_vm3 = vweird.f32 %v1333_v20  ;;  %v1335_v30 = vpop.eup %1334 }
 0x51e   :  { %vm467_vm6 = vmor %vm465_vm4, %vm466_vm3 }
 0x51f   :  { %v462_v23 = vsub.f32 1.0, %v461_v22 }
 0x521   :  { %v463_v25 = vmul.f32 %v1333_v20, %v462_v23 }
 0x523   :  { %v464_v27 = vadd.f32 %v1333_v20, %v463_v25 }
 0x525   :  { %v468_v29 = vsel %vm467_vm6, %v1333_v20, %v464_v27 }
 0x526   :  { %v473_v31 = vsel %vm470_vm7, %v472_v28, %v468_v29 }
 0x527   :  { %v475_v32 = vsel %vm175_vm2, %v1335_v30, %v473_v31 }
 0x528   :  { %487 = vrot.lane.b32.xlu1 %v475_v32, %s1462_s12  ;;  %481 = vrot.lane.b32.xlu0 %v475_v32, %s1461_s11 }
 0x529   :  { %477 = vrot.lane.b32.xlu2 %v475_v32, %s1460_s10 }
 0x531   :  { %68 = vperm.xlu2 %1295, %v29_v33  }
 0x583   :  { %v478_v34 = vpop.permute.xlu2 %477 }
 0x584   :  { %v480_v36 = vmul.f32 %v478_v34, %v475_v32  ;;  %v31_v34 = vld [vmem:[%s1803_s0 + $0x38] sm:$0xff] }
 0x58b   :  { %v69_v42 = vpop.permute.xlu2 %68 }
 0x58c   :  { %v129_v43 = vmul.f32 %v1561_v7, %v69_v42 }
 0x58e   :  { %v146_v44 = vadd.f32 %v1567_v10, %v129_v43 }
 0x59a   :  { %v482_v35 = vpop.permute.xlu0 %481  ;;  %v488_v40 = vpop.permute.xlu1 %487 }
 0x59b   :  { %v484_v37 = vmul.f32 %v482_v35, %v423_v6 }
 0x59d   :  { %v485_v38 = vadd.f32 %v484_v37, %v480_v36 }
 0x59f   :  { %1336 = vtanh.f32 %v485_v38 }
 0x5a5   :  { %v1337_v39 = vpop.eup %1336 }
 0x5a6   :  { %v490_v41 = vmul.f32 %v1337_v39, %v488_v40 }
 0x5a8   :  { %1265 = vmatmul.msk.f32.vlgmr.msrb.gmra.mxu1 %vm181_vm5, %v490_v41 }
 0x5a9   :  { %1004 = vmatpush.msrb.mxu1 %v1502_v0 }
 0x5ab   :  { %1005 = vmatpush.msrb.mxu1 %v1507_v1 }
 0x5ad   :  { %1006 = vmatpush.msrb.mxu1 %v1516_v4 }
 0x5af   :  { %1007 = vmatpush.msrb.mxu1 %v1523_v5 }
 0x625   :  { %v513_v45 = vpop.f32.mrf.mxu1 }
 0x626   :  { %v516_v46 = vadd.f32 %v513_v45, %v146_v44 }
 0x628   :  { %v1266_v47 = vmul.f32 -1.442695, %v516_v46 }
 0x62a   :  { %1338 = vpow2.f32 %v1266_v47 }
 0x630   :  { %v1339_v48 = vpop.eup %1338 }
 0x631   :  { %v521_v49 = vadd.f32 1.0, %v1339_v48 }
 0x633   :  { %1340 = vrcp.f32 %v521_v49  ;;  %v533_v53 = vand.u32 2147483648, %v521_v49  ;;  %v531_v55 = vand.u32 2147483647, %v521_v49  ;;  %vm527_vm9 = vweird.f32 %v521_v49 }
 0x634   :  { %1342 = vtanh.f32 %v516_v46 }
 0x635   :  { %v534_v57 = vor.u32 1.1754944e-38, %v533_v53  ;;  %vm532_vm11 = vcmp.eq.f32.partialorder %v531_v55, 8.507059e+37 }
 0x639   :  { %v1341_v50 = vpop.eup %1340 }
 0x63a   :  { %v523_v51 = vmul.f32 %v1341_v50, %v521_v49  ;;  %vm528_vm8 = vweird.f32 %v1341_v50  ;;  %v1343_v59 = vpop.eup %1342 }
 0x63b   :  { %vm529_vm10 = vmor %vm527_vm9, %vm528_vm8 }
 0x63c   :  { %v524_v52 = vsub.f32 1.0, %v523_v51 }
 0x63e   :  { %v525_v54 = vmul.f32 %v1341_v50, %v524_v52 }
 0x640   :  { %v526_v56 = vadd.f32 %v1341_v50, %v525_v54 }
 0x642   :  { %v530_v58 = vsel %vm529_vm10, %v1341_v50, %v526_v56 }
 0x643   :  { %v535_v60 = vsel %vm532_vm11, %v534_v57, %v530_v58 }
 0x644   :  { %v537_v61 = vsel %vm175_vm2, %v1343_v59, %v535_v60  ;;  %v32_v59 = vld [vmem:[%s1803_s0 + $0x40] sm:$0xff] }
 0x645   :  { %549 = vrot.lane.b32.xlu2 %v537_v61, %s1462_s12  ;;  %543 = vrot.lane.b32.xlu1 %v537_v61, %s1461_s11 }
 0x646   :  { %539 = vrot.lane.b32.xlu0 %v537_v61, %s1460_s10 }
 0x64e   :  { %73 = vperm.xlu0 %1294, %v30_v62  }
 0x69f   :  { %v550_v11 = vpop.permute.xlu2 %549 }
 0x6b7   :  { %v544_v63 = vpop.permute.xlu1 %543 }
 0x6b8   :  { %v546_v2 = vmul.f32 %v544_v63, %v485_v38  ;;  %v540_v3 = vpop.permute.xlu0 %539 }
 0x6b9   :  { %v542_v6 = vmul.f32 %v540_v3, %v537_v61 }
 0x6bb   :  { %v547_v8 = vadd.f32 %v546_v2, %v542_v6 }
 0x6bd   :  { %1344 = vtanh.f32 %v547_v8 }
 0x6c0   :  { %v74_v13 = vpop.permute.xlu0 %73 }
 0x6c1   :  { %v130_v14 = vmul.f32 %v1561_v7, %v74_v13 }
 0x6c3   :  { %v1345_v9 = vpop.eup %1344  ;;  %v147_v15 = vadd.f32 %v1567_v10, %v130_v14 }
 0x6c4   :  { %v552_v12 = vmul.f32 %v1345_v9, %v550_v11 }
 0x6c6   :  { %1267 = vmatmul.msk.f32.vlgmr.msrb.gmra.mxu2 %vm181_vm5, %v552_v12 }
 0x6c7   :  { %1066 = vmatpush.msrb.mxu2 %v1502_v0 }
 0x6c9   :  { %1067 = vmatpush.msrb.mxu2 %v1507_v1 }
 0x6cb   :  { %1068 = vmatpush.msrb.mxu2 %v1516_v4 }
 0x6cd   :  { %1069 = vmatpush.msrb.mxu2 %v1523_v5 }
 0x749   :  { %v575_v16 = vpop.f32.mrf.mxu2 }
 0x74a   :  { %v578_v17 = vadd.f32 %v575_v16, %v147_v15 }
 0x74c   :  { %v1268_v18 = vmul.f32 -1.442695, %v578_v17 }
 0x74e   :  { %1346 = vpow2.f32 %v1268_v18 }
 0x754   :  { %v1347_v19 = vpop.eup %1346 }
 0x755   :  { %v583_v20 = vadd.f32 1.0, %v1347_v19 }
 0x757   :  { %1348 = vrcp.f32 %v583_v20  ;;  %v595_v25 = vand.u32 2147483648, %v583_v20  ;;  %v593_v27 = vand.u32 2147483647, %v583_v20  ;;  %vm589_vm13 = vweird.f32 %v583_v20 }
 0x758   :  { %1350 = vtanh.f32 %v578_v17 }
 0x759   :  { %v596_v29 = vor.u32 1.1754944e-38, %v595_v25  ;;  %vm594_vm15 = vcmp.eq.f32.partialorder %v593_v27, 8.507059e+37 }
 0x75d   :  { %v1349_v22 = vpop.eup %1348 }
 0x75e   :  { %v585_v23 = vmul.f32 %v1349_v22, %v583_v20  ;;  %vm590_vm12 = vweird.f32 %v1349_v22  ;;  %v1351_v31 = vpop.eup %1350 }
 0x75f   :  { %vm591_vm14 = vmor %vm589_vm13, %vm590_vm12 }
 0x760   :  { %v586_v24 = vsub.f32 1.0, %v585_v23 }
 0x762   :  { %v587_v26 = vmul.f32 %v1349_v22, %v586_v24 }
 0x764   :  { %v588_v28 = vadd.f32 %v1349_v22, %v587_v26 }
 0x766   :  { %v592_v30 = vsel %vm591_vm14, %v1349_v22, %v588_v28 }
 0x767   :  { %v597_v32 = vsel %vm594_vm15, %v596_v29, %v592_v30 }
 0x768   :  { %v599_v33 = vsel %vm175_vm2, %v1351_v31, %v597_v32  ;;  %v33_v31 = vld [vmem:[%s1803_s0 + $0x48] sm:$0xff] }
 0x769   :  { %611 = vrot.lane.b32.xlu0 %v599_v33, %s1462_s12  ;;  %605 = vrot.lane.b32.xlu2 %v599_v33, %s1461_s11 }
 0x76a   :  { %601 = vrot.lane.b32.xlu1 %v599_v33, %s1460_s10 }
 0x772   :  { %78 = vperm.xlu1 %1296, %v31_v34  }
 0x7c3   :  { %v606_v35 = vpop.permute.xlu2 %605 }
 0x7c4   :  { %v608_v37 = vmul.f32 %v606_v35, %v547_v8 }
 0x7db   :  { %v612_v41 = vpop.permute.xlu0 %611 }
 0x7dc   :  { %v602_v36 = vpop.permute.xlu1 %601 }
 0x7dd   :  { %v604_v38 = vmul.f32 %v602_v36, %v599_v33 }
 0x7df   :  { %v609_v39 = vadd.f32 %v608_v37, %v604_v38 }
 0x7e1   :  { %1352 = vtanh.f32 %v609_v39 }
 0x7e4   :  { %v79_v43 = vpop.permute.xlu1 %78 }
 0x7e5   :  { %v131_v44 = vmul.f32 %v1561_v7, %v79_v43 }
 0x7e7   :  { %v1353_v40 = vpop.eup %1352  ;;  %v148_v45 = vadd.f32 %v1567_v10, %v131_v44 }
 0x7e8   :  { %v614_v42 = vmul.f32 %v1353_v40, %v612_v41 }
 0x7ea   :  { %1269 = vmatmul.msk.f32.vlgmr.msrb.gmra.mxu3 %vm181_vm5, %v614_v42 }
 0x7eb   :  { %1128 = vmatpush.msrb.mxu3 %v1502_v0 }
 0x7ed   :  { %1129 = vmatpush.msrb.mxu3 %v1507_v1 }
 0x7ef   :  { %1130 = vmatpush.msrb.mxu3 %v1516_v4 }
 0x7f1   :  { %1131 = vmatpush.msrb.mxu3 %v1523_v5 }
 0x86d   :  { %v637_v46 = vpop.f32.mrf.mxu3 }
 0x86e   :  { %v640_v47 = vadd.f32 %v637_v46, %v148_v45 }
 0x870   :  { %v1270_v48 = vmul.f32 -1.442695, %v640_v47 }
 0x872   :  { %1354 = vpow2.f32 %v1270_v48 }
 0x878   :  { %v1355_v49 = vpop.eup %1354 }
 0x879   :  { %v645_v50 = vadd.f32 1.0, %v1355_v49 }
 0x87b   :  { %1356 = vrcp.f32 %v645_v50  ;;  %v657_v1 = vand.u32 2147483648, %v645_v50  ;;  %v655_v5 = vand.u32 2147483647, %v645_v50  ;;  %vm651_vm1 = vweird.f32 %v645_v50 }
 0x87c   :  { %1358 = vtanh.f32 %v640_v47 }
 0x87d   :  { %v658_v54 = vor.u32 1.1754944e-38, %v657_v1  ;;  %vm656_vm4 = vcmp.eq.f32.partialorder %v655_v5, 8.507059e+37 }
 0x881   :  { %v1357_v51 = vpop.eup %1356 }
 0x882   :  { %v647_v0 = vmul.f32 %v1357_v51, %v645_v50  ;;  %vm652_vm0 = vweird.f32 %v1357_v51  ;;  %v1359_v56 = vpop.eup %1358 }
 0x883   :  { %vm653_vm3 = vmor %vm651_vm1, %vm652_vm0 }
 0x884   :  { %v648_v52 = vsub.f32 1.0, %v647_v0 }
 0x886   :  { %v649_v4 = vmul.f32 %v1357_v51, %v648_v52 }
 0x888   :  { %v650_v53 = vadd.f32 %v1357_v51, %v649_v4 }
 0x88a   :  { %v654_v55 = vsel %vm653_vm3, %v1357_v51, %v650_v53 }
 0x88b   :  { %v659_v57 = vsel %vm656_vm4, %v658_v54, %v654_v55 }
 0x88c   :  { %v661_v58 = vsel %vm175_vm2, %v1359_v56, %v659_v57  ;;  %v34_v56 = vld [vmem:[%s1803_s0 + $0x50] sm:$0xff] }
 0x88d   :  { %673 = vrot.lane.b32.xlu1 %v661_v58, %s1462_s12  ;;  %667 = vrot.lane.b32.xlu0 %v661_v58, %s1461_s11 }
 0x88e   :  { %663 = vrot.lane.b32.xlu2 %v661_v58, %s1460_s10 }
 0x896   :  { %83 = vperm.xlu2 %1295, %v32_v59  }
 0x8e8   :  { %v664_v60 = vpop.permute.xlu2 %663 }
 0x8e9   :  { %v666_v62 = vmul.f32 %v664_v60, %v661_v58 }
 0x8f0   :  { %v84_v9 = vpop.permute.xlu2 %83 }
 0x8f1   :  { %v132_v11 = vmul.f32 %v1561_v7, %v84_v9 }
 0x8f3   :  { %v149_v12 = vadd.f32 %v1567_v10, %v132_v11 }
 0x8ff   :  { %v668_v61 = vpop.permute.xlu0 %667  ;;  %v674_v6 = vpop.permute.xlu1 %673 }
 0x900   :  { %v670_v63 = vmul.f32 %v668_v61, %v609_v39 }
 0x902   :  { %v671_v2 = vadd.f32 %v670_v63, %v666_v62 }
 0x904   :  { %1360 = vtanh.f32 %v671_v2 }
 0x90a   :  { %v1361_v3 = vpop.eup %1360 }
 0x90b   :  { %v676_v8 = vmul.f32 %v1361_v3, %v674_v6 }
 0x90d   :  { %1271 = vmatmul.msk.f32.vlgmr.msra.gmra.mxu0 %vm181_vm5, %v676_v8 }
 0x98a   :  { %v699_v13 = vpop.f32.mrf.mxu0 }
 0x98b   :  { %v702_v14 = vadd.f32 %v699_v13, %v149_v12 }
 0x98d   :  { %v1272_v15 = vmul.f32 -1.442695, %v702_v14 }
 0x98f   :  { %1362 = vpow2.f32 %v1272_v15 }
 0x995   :  { %v1363_v16 = vpop.eup %1362 }
 0x996   :  { %v707_v17 = vadd.f32 1.0, %v1363_v16 }
 0x998   :  { %1364 = vrcp.f32 %v707_v17  ;;  %v719_v22 = vand.u32 2147483648, %v707_v17  ;;  %v717_v24 = vand.u32 2147483647, %v707_v17  ;;  %vm713_vm7 = vweird.f32 %v707_v17 }
 0x999   :  { %1366 = vtanh.f32 %v702_v14 }
 0x99a   :  { %v720_v26 = vor.u32 1.1754944e-38, %v719_v22  ;;  %vm718_vm9 = vcmp.eq.f32.partialorder %v717_v24, 8.507059e+37 }
 0x99e   :  { %v1365_v18 = vpop.eup %1364 }
 0x99f   :  { %v709_v19 = vmul.f32 %v1365_v18, %v707_v17  ;;  %vm714_vm6 = vweird.f32 %v1365_v18  ;;  %v1367_v28 = vpop.eup %1366 }
 0x9a0   :  { %vm715_vm8 = vmor %vm713_vm7, %vm714_vm6 }
 0x9a1   :  { %v710_v20 = vsub.f32 1.0, %v709_v19 }
 0x9a3   :  { %v711_v23 = vmul.f32 %v1365_v18, %v710_v20 }
 0x9a5   :  { %v712_v25 = vadd.f32 %v1365_v18, %v711_v23 }
 0x9a7   :  { %v716_v27 = vsel %vm715_vm8, %v1365_v18, %v712_v25 }
 0x9a8   :  { %v721_v29 = vsel %vm718_vm9, %v720_v26, %v716_v27 }
 0x9a9   :  { %v723_v30 = vsel %vm175_vm2, %v1367_v28, %v721_v29  ;;  %v35_v28 = vld [vmem:[%s1803_s0 + $0x58] sm:$0xff] }
 0x9aa   :  { %735 = vrot.lane.b32.xlu2 %v723_v30, %s1462_s12  ;;  %729 = vrot.lane.b32.xlu1 %v723_v30, %s1461_s11 }
 0x9ab   :  { %725 = vrot.lane.b32.xlu0 %v723_v30, %s1460_s10 }
 0x9b3   :  { %88 = vperm.xlu0 %1294, %v33_v31  }
 0xa04   :  { %v736_v38 = vpop.permute.xlu2 %735 }
 0xa1c   :  { %v730_v32 = vpop.permute.xlu1 %729 }
 0xa1d   :  { %v732_v33 = vmul.f32 %v730_v32, %v671_v2  ;;  %v726_v34 = vpop.permute.xlu0 %725 }
 0xa1e   :  { %v728_v35 = vmul.f32 %v726_v34, %v723_v30 }
 0xa20   :  { %v733_v36 = vadd.f32 %v732_v33, %v728_v35 }
 0xa22   :  { %1368 = vtanh.f32 %v733_v36 }
 0xa25   :  { %v89_v40 = vpop.permute.xlu0 %88 }
 0xa26   :  { %v133_v41 = vmul.f32 %v1561_v7, %v89_v40 }
 0xa28   :  { %v1369_v37 = vpop.eup %1368  ;;  %v150_v42 = vadd.f32 %v1567_v10, %v133_v41 }
 0xa29   :  { %v738_v39 = vmul.f32 %v1369_v37, %v736_v38 }
 0xa2b   :  { %1273 = vmatmul.msk.f32.vlgmr.msra.gmra.mxu1 %vm181_vm5, %v738_v39 }
 0xaa8   :  { %v761_v43 = vpop.f32.mrf.mxu1 }
 0xaa9   :  { %v764_v44 = vadd.f32 %v761_v43, %v150_v42 }
 0xaab   :  { %v1274_v45 = vmul.f32 -1.442695, %v764_v44 }
 0xaad   :  { %1370 = vpow2.f32 %v1274_v45 }
 0xab3   :  { %v1371_v46 = vpop.eup %1370 }
 0xab4   :  { %v769_v47 = vadd.f32 1.0, %v1371_v46 }
 0xab6   :  { %1372 = vrcp.f32 %v769_v47  ;;  %v781_v51 = vand.u32 2147483648, %v769_v47  ;;  %v779_v52 = vand.u32 2147483647, %v769_v47  ;;  %vm775_vm11 = vweird.f32 %v769_v47 }
 0xab7   :  { %1374 = vtanh.f32 %v764_v44 }
 0xab8   :  { %v782_v4 = vor.u32 1.1754944e-38, %v781_v51  ;;  %vm780_vm13 = vcmp.eq.f32.partialorder %v779_v52, 8.507059e+37 }
 0xabc   :  { %v1373_v48 = vpop.eup %1372 }
 0xabd   :  { %v771_v49 = vmul.f32 %v1373_v48, %v769_v47  ;;  %vm776_vm10 = vweird.f32 %v1373_v48  ;;  %v1375_v53 = vpop.eup %1374 }
 0xabe   :  { %vm777_vm12 = vmor %vm775_vm11, %vm776_vm10 }
 0xabf   :  { %v772_v50 = vsub.f32 1.0, %v771_v49 }
 0xac1   :  { %v773_v0 = vmul.f32 %v1373_v48, %v772_v50 }
 0xac3   :  { %v774_v1 = vadd.f32 %v1373_v48, %v773_v0 }
 0xac5   :  { %v778_v5 = vsel %vm777_vm12, %v1373_v48, %v774_v1 }
 0xac6   :  { %v783_v54 = vsel %vm780_vm13, %v782_v4, %v778_v5  ;;  %v36_v4 = vld [vmem:[%s1803_s0 + $0x60] sm:$0xff] }
 0xac7   :  { %v785_v55 = vsel %vm175_vm2, %v1375_v53, %v783_v54 }
 0xac8   :  { %797 = vrot.lane.b32.xlu0 %v785_v55, %s1462_s12  ;;  %791 = vrot.lane.b32.xlu2 %v785_v55, %s1461_s11 }
 0xac9   :  { %787 = vrot.lane.b32.xlu1 %v785_v55, %s1460_s10 }
 0xad1   :  { %93 = vperm.xlu1 %1296, %v34_v56  }
 0xb22   :  { %v792_v57 = vpop.permute.xlu2 %791 }
 0xb23   :  { %v794_v59 = vmul.f32 %v792_v57, %v733_v36 }
 0xb3a   :  { %v798_v63 = vpop.permute.xlu0 %797 }
 0xb3b   :  { %v788_v58 = vpop.permute.xlu1 %787 }
 0xb3c   :  { %v790_v60 = vmul.f32 %v788_v58, %v785_v55 }
 0xb3e   :  { %v795_v61 = vadd.f32 %v794_v59, %v790_v60 }
 0xb40   :  { %1376 = vtanh.f32 %v795_v61 }
 0xb43   :  { %v94_v3 = vpop.permute.xlu1 %93 }
 0xb44   :  { %v134_v6 = vmul.f32 %v1561_v7, %v94_v3 }
 0xb46   :  { %v1377_v62 = vpop.eup %1376  ;;  %v151_v8 = vadd.f32 %v1567_v10, %v134_v6 }
 0xb47   :  { %v800_v2 = vmul.f32 %v1377_v62, %v798_v63  ;;  %v1740_v63 = vld [vmem:[%s1806_s3] sm:$0xff] }
 0xb49   :  { %1275 = vmatmul.msk.f32.vlgmr.msra.gmra.mxu2 %vm181_vm5, %v800_v2 }
 0xbcc   :  { %v823_v9 = vpop.f32.mrf.mxu2 }
 0xbcd   :  { %v826_v11 = vadd.f32 %v823_v9, %v151_v8 }
 0xbcf   :  { %v1276_v12 = vmul.f32 -1.442695, %v826_v11 }
 0xbd1   :  { %1378 = vpow2.f32 %v1276_v12 }
 0xbd7   :  { %v1379_v13 = vpop.eup %1378 }
 0xbd8   :  { %v831_v14 = vadd.f32 1.0, %v1379_v13 }
 0xbda   :  { %1380 = vrcp.f32 %v831_v14  ;;  %v843_v18 = vand.u32 2147483648, %v831_v14  ;;  %v841_v20 = vand.u32 2147483647, %v831_v14  ;;  %vm837_vm15 = vweird.f32 %v831_v14 }
 0xbdb   :  { %1382 = vtanh.f32 %v826_v11 }
 0xbdc   :  { %v844_v23 = vor.u32 1.1754944e-38, %v843_v18  ;;  %vm842_vm1 = vcmp.eq.f32.partialorder %v841_v20, 8.507059e+37 }
 0xbe0   :  { %v1381_v15 = vpop.eup %1380 }
 0xbe1   :  { %v833_v16 = vmul.f32 %v1381_v15, %v831_v14  ;;  %vm838_vm14 = vweird.f32 %v1381_v15  ;;  %v1383_v25 = vpop.eup %1382 }
 0xbe2   :  { %vm839_vm0 = vmor %vm837_vm15, %vm838_vm14 }
 0xbe3   :  { %v834_v17 = vsub.f32 1.0, %v833_v16 }
 0xbe5   :  { %v835_v19 = vmul.f32 %v1381_v15, %v834_v17 }
 0xbe7   :  { %v836_v22 = vadd.f32 %v1381_v15, %v835_v19 }
 0xbe9   :  { %v840_v24 = vsel %vm839_vm0, %v1381_v15, %v836_v22 }
 0xbea   :  { %v845_v26 = vsel %vm842_vm1, %v844_v23, %v840_v24 }
 0xbeb   :  { %v847_v27 = vsel %vm175_vm2, %v1383_v25, %v845_v26  ;;  %v37_v25 = vld [vmem:[%s1803_s0 + $0x68] sm:$0xff] }
 0xbec   :  { %859 = vrot.lane.b32.xlu1 %v847_v27, %s1462_s12  ;;  %853 = vrot.lane.b32.xlu0 %v847_v27, %s1461_s11 }
 0xbed   :  { %849 = vrot.lane.b32.xlu2 %v847_v27, %s1460_s10 }
 0xbf5   :  { %98 = vperm.xlu2 %1295, %v35_v28  }
 0xc47   :  { %v850_v29 = vpop.permute.xlu2 %849 }
 0xc48   :  { %v852_v31 = vmul.f32 %v850_v29, %v847_v27 }
 0xc4f   :  { %v99_v37 = vpop.permute.xlu2 %98 }
 0xc50   :  { %v135_v38 = vmul.f32 %v1561_v7, %v99_v37 }
 0xc52   :  { %v152_v39 = vadd.f32 %v1567_v10, %v135_v38 }
 0xc5e   :  { %v854_v30 = vpop.permute.xlu0 %853  ;;  %v860_v35 = vpop.permute.xlu1 %859 }
 0xc5f   :  { %v856_v32 = vmul.f32 %v854_v30, %v795_v61  ;;  %v1734_v61 = vld [vmem:[%s1804_s1] ss:$0 sm:$0xff] }
 0xc61   :  { %v857_v33 = vadd.f32 %v856_v32, %v852_v31 }
 0xc63   :  { %1384 = vtanh.f32 %v857_v33 }
 0xc69   :  { %v1385_v34 = vpop.eup %1384 }
 0xc6a   :  { %v862_v36 = vmul.f32 %v1385_v34, %v860_v35 }
 0xc6c   :  { %1277 = vmatmul.msk.f32.vlgmr.msra.gmra.mxu3 %vm181_vm5, %v862_v36 }
 0xcef   :  { %v885_v40 = vpop.f32.mrf.mxu3 }
 0xcf0   :  { %v888_v41 = vadd.f32 %v885_v40, %v152_v39 }
 0xcf2   :  { %v1278_v42 = vmul.f32 -1.442695, %v888_v41 }
 0xcf4   :  { %1386 = vpow2.f32 %v1278_v42 }
 0xcfa   :  { %v1387_v43 = vpop.eup %1386 }
 0xcfb   :  { %v893_v44 = vadd.f32 1.0, %v1387_v43 }
 0xcfd   :  { %1388 = vrcp.f32 %v893_v44  ;;  %v905_v48 = vand.u32 2147483648, %v893_v44  ;;  %v903_v50 = vand.u32 2147483647, %v893_v44  ;;  %vm899_vm4 = vweird.f32 %v893_v44 }
 0xcfe   :  { %1390 = vtanh.f32 %v888_v41 }
 0xcff   :  { %v906_v7 = vor.u32 1.1754944e-38, %v905_v48  ;;  %vm904_vm7 = vcmp.eq.f32.partialorder %v903_v50, 8.507059e+37 }
 0xd03   :  { %v1389_v45 = vpop.eup %1388 }
 0xd04   :  { %v895_v46 = vmul.f32 %v1389_v45, %v893_v44  ;;  %vm900_vm3 = vweird.f32 %v1389_v45  ;;  %v1391_v0 = vpop.eup %1390 }
 0xd05   :  { %vm901_vm6 = vmor %vm899_vm4, %vm900_vm3 }
 0xd06   :  { %v896_v47 = vsub.f32 1.0, %v895_v46 }
 0xd08   :  { %v897_v49 = vmul.f32 %v1389_v45, %v896_v47 }
 0xd0a   :  { %v898_v51 = vadd.f32 %v1389_v45, %v897_v49 }
 0xd0c   :  { %v902_v10 = vsel %vm901_vm6, %v1389_v45, %v898_v51 }
 0xd0d   :  { %v907_v52 = vsel %vm904_vm7, %v906_v7, %v902_v10 }
 0xd0e   :  { %v909_v1 = vsel %vm175_vm2, %v1391_v0, %v907_v52  ;;  %v38_v0 = vld [vmem:[%s1803_s0 + $0x70] sm:$0xff] }
 0xd0f   :  { %921 = vrot.lane.b32.xlu2 %v909_v1, %s1462_s12  ;;  %915 = vrot.lane.b32.xlu1 %v909_v1, %s1461_s11 }
 0xd10   :  { %911 = vrot.lane.b32.xlu0 %v909_v1, %s1460_s10 }
 0xd18   :  { %103 = vperm.xlu0 %1294, %v36_v4  }
 0xd69   :  { %v922_v58 = vpop.permute.xlu2 %921 }
 0xd81   :  { %v916_v5 = vpop.permute.xlu1 %915 }
 0xd82   :  { %v918_v53 = vmul.f32 %v916_v5, %v857_v33  ;;  %v912_v54 = vpop.permute.xlu0 %911 }
 0xd83   :  { %v914_v55 = vmul.f32 %v912_v54, %v909_v1 }
 0xd85   :  { %v919_v56 = vadd.f32 %v918_v53, %v914_v55 }
 0xd87   :  { %1392 = vtanh.f32 %v919_v56 }
 0xd8a   :  { %v104_v60 = vpop.permute.xlu0 %103 }
 0xd8b   :  { %v136_v62 = vmul.f32 %v1734_v61, %v104_v60 }
 0xd8d   :  { %v1393_v57 = vpop.eup %1392  ;;  %v153_v2 = vadd.f32 %v1740_v63, %v136_v62 }
 0xd8e   :  { %v924_v59 = vmul.f32 %v1393_v57, %v922_v58 }
 0xd90   :  { %1279 = vmatmul.msk.f32.vlgmr.msrb.gmra.mxu0 %vm181_vm5, %v924_v59 }
 0xe0d   :  { %v947_v3 = vpop.f32.mrf.mxu0 }
 0xe0e   :  { %v950_v6 = vadd.f32 %v947_v3, %v153_v2 }
 0xe10   :  { %v1280_v8 = vmul.f32 -1.442695, %v950_v6 }
 0xe12   :  { %1394 = vpow2.f32 %v1280_v8 }
 0xe18   :  { %v1395_v9 = vpop.eup %1394 }
 0xe19   :  { %v955_v11 = vadd.f32 1.0, %v1395_v9 }
 0xe1b   :  { %1396 = vrcp.f32 %v955_v11  ;;  %v967_v15 = vand.u32 2147483648, %v955_v11  ;;  %v965_v17 = vand.u32 2147483647, %v955_v11  ;;  %vm961_vm9 = vweird.f32 %v955_v11 }
 0xe1c   :  { %1398 = vtanh.f32 %v950_v6 }
 0xe1d   :  { %v968_v19 = vor.u32 1.1754944e-38, %v967_v15  ;;  %vm966_vm11 = vcmp.eq.f32.partialorder %v965_v17, 8.507059e+37 }
 0xe21   :  { %v1397_v12 = vpop.eup %1396 }
 0xe22   :  { %v957_v13 = vmul.f32 %v1397_v12, %v955_v11  ;;  %vm962_vm8 = vweird.f32 %v1397_v12  ;;  %v1399_v22 = vpop.eup %1398 }
 0xe23   :  { %vm963_vm10 = vmor %vm961_vm9, %vm962_vm8 }
 0xe24   :  { %v958_v14 = vsub.f32 1.0, %v957_v13 }
 0xe26   :  { %v959_v16 = vmul.f32 %v1397_v12, %v958_v14 }
 0xe28   :  { %v960_v18 = vadd.f32 %v1397_v12, %v959_v16 }
 0xe2a   :  { %v964_v20 = vsel %vm963_vm10, %v1397_v12, %v960_v18 }
 0xe2b   :  { %v969_v23 = vsel %vm966_vm11, %v968_v19, %v964_v20 }
 0xe2c   :  { %v971_v24 = vsel %vm175_vm2, %v1399_v22, %v969_v23  ;;  %v39_v22 = vld [vmem:[%s1803_s0 + $0x78] sm:$0xff] }
 0xe2d   :  { %983 = vrot.lane.b32.xlu0 %v971_v24, %s1462_s12  ;;  %977 = vrot.lane.b32.xlu2 %v971_v24, %s1461_s11 }
 0xe2e   :  { %973 = vrot.lane.b32.xlu1 %v971_v24, %s1460_s10 }
 0xe36   :  { %108 = vperm.xlu1 %1296, %v37_v25  }
 0xe87   :  { %v978_v26 = vpop.permute.xlu2 %977 }
 0xe88   :  { %v980_v28 = vmul.f32 %v978_v26, %v919_v56 }
 0xe9f   :  { %v984_v32 = vpop.permute.xlu0 %983 }
 0xea0   :  { %v974_v27 = vpop.permute.xlu1 %973 }
 0xea1   :  { %v976_v29 = vmul.f32 %v974_v27, %v971_v24 }
 0xea3   :  { %v981_v30 = vadd.f32 %v980_v28, %v976_v29 }
 0xea5   :  { %1400 = vtanh.f32 %v981_v30 }
 0xea8   :  { %v109_v34 = vpop.permute.xlu1 %108 }
 0xea9   :  { %v137_v35 = vmul.f32 %v1734_v61, %v109_v34 }
 0xeab   :  { %v1401_v31 = vpop.eup %1400  ;;  %v154_v36 = vadd.f32 %v1740_v63, %v137_v35 }
 0xeac   :  { %v986_v33 = vmul.f32 %v1401_v31, %v984_v32 }
 0xeae   :  { %1281 = vmatmul.msk.f32.vlgmr.msrb.gmra.mxu1 %vm181_vm5, %v986_v33 }
 0xf2b   :  { %v1009_v37 = vpop.f32.mrf.mxu1 }
 0xf2c   :  { %v1012_v38 = vadd.f32 %v1009_v37, %v154_v36 }
 0xf2e   :  { %v1282_v39 = vmul.f32 -1.442695, %v1012_v38 }
 0xf30   :  { %1402 = vpow2.f32 %v1282_v39 }
 0xf36   :  { %v1403_v40 = vpop.eup %1402 }
 0xf37   :  { %v1017_v41 = vadd.f32 1.0, %v1403_v40 }
 0xf39   :  { %1404 = vrcp.f32 %v1017_v41  ;;  %v1029_v45 = vand.u32 2147483648, %v1017_v41  ;;  %v1027_v47 = vand.u32 2147483647, %v1017_v41  ;;  %vm1023_vm13 = vweird.f32 %v1017_v41 }
 0xf3a   :  { %1406 = vtanh.f32 %v1012_v38 }
 0xf3b   :  { %v1030_v49 = vor.u32 1.1754944e-38, %v1029_v45  ;;  %vm1028_vm15 = vcmp.eq.f32.partialorder %v1027_v47, 8.507059e+37 }
 0xf3f   :  { %v1405_v42 = vpop.eup %1404 }
 0xf40   :  { %v1019_v43 = vmul.f32 %v1405_v42, %v1017_v41  ;;  %vm1024_vm12 = vweird.f32 %v1405_v42  ;;  %v1407_v51 = vpop.eup %1406 }
 0xf41   :  { %vm1025_vm14 = vmor %vm1023_vm13, %vm1024_vm12 }
 0xf42   :  { %v1020_v44 = vsub.f32 1.0, %v1019_v43 }
 0xf44   :  { %v1021_v46 = vmul.f32 %v1405_v42, %v1020_v44 }
 0xf46   :  { %v1022_v48 = vadd.f32 %v1405_v42, %v1021_v46 }
 0xf48   :  { %v1026_v50 = vsel %vm1025_vm14, %v1405_v42, %v1022_v48 }
 0xf49   :  { %v1031_v7 = vsel %vm1028_vm15, %v1030_v49, %v1026_v50  ;;  %v1177_v49 = vld [vmem:[%s1808_s5] sm:$0xff]  ;;  %v1176_v50 = vld [vmem:[%s1807_s4 + $0x18] sm:$0xff] }
 0xf4a   :  { %v1033_v10 = vsel %vm175_vm2, %v1407_v51, %v1031_v7  ;;  %1198 = vmatpush.msra.mxu0 %v1176_v50  ;;  %v1174_v51 = vld [vmem:[%s1807_s4 + $0x8] sm:$0xff]  ;;  %v1173_v7 = vld [vmem:[%s1807_s4] sm:$0xff]  ;;  %s1463_s4 = smov [#allocation3]  }
 0xf4b   :  { %1045 = vrot.lane.b32.xlu1 %v1033_v10, %s1462_s12  ;;  %1039 = vrot.lane.b32.xlu0 %v1033_v10, %s1461_s11  ;;  %s1245_s5 = sshll.u32 %s1463_s4, 4  ;;  %s1246_s5 = int_to_ptr.vmem [resolvable:$true] %s1245_s5 }
 0xf4c   :  { %1035 = vrot.lane.b32.xlu2 %v1033_v10, %s1460_s10  ;;  %1199 = vmatpush.msra.mxu0 %v1175_v21 }
 0xf4e   :  { %1200 = vmatpush.msra.mxu0 %v1174_v51 }
 0xf50   :  { %1201 = vmatpush.msra.mxu0 %v1173_v7 }
 0xf54   :  { %113 = vperm.xlu2 %1295, %v38_v0  }
 0xfa6   :  { %v1036_v52 = vpop.permute.xlu2 %1035 }
 0xfa7   :  { %v1038_v4 = vmul.f32 %v1036_v52, %v1033_v10 }
 0xfae   :  { %v114_v57 = vpop.permute.xlu2 %113 }
 0xfaf   :  { %v138_v58 = vmul.f32 %v1734_v61, %v114_v57 }
 0xfb1   :  { %v155_v59 = vadd.f32 %v1740_v63, %v138_v58 }
 0xfbd   :  { %v1040_v1 = vpop.permute.xlu0 %1039  ;;  %v1046_v55 = vpop.permute.xlu1 %1045 }
 0xfbe   :  { %v1042_v5 = vmul.f32 %v1040_v1, %v981_v30 }
 0xfc0   :  { %v1043_v53 = vadd.f32 %v1042_v5, %v1038_v4 }
 0xfc2   :  { %1408 = vtanh.f32 %v1043_v53 }
 0xfc8   :  { %v1409_v54 = vpop.eup %1408 }
 0xfc9   :  { %v1048_v56 = vmul.f32 %v1409_v54, %v1046_v55 }
 0xfcb   :  { %1283 = vmatmul.msk.f32.vlgmr.msrb.gmra.mxu2 %vm181_vm5, %v1048_v56 }
0x104e   :  { %v1071_v60 = vpop.f32.mrf.mxu2 }
0x104f   :  { %v1074_v62 = vadd.f32 %v1071_v60, %v155_v59 }
0x1051   :  { %v1284_v2 = vmul.f32 -1.442695, %v1074_v62 }
0x1053   :  { %1410 = vpow2.f32 %v1284_v2 }
0x1059   :  { %v1411_v3 = vpop.eup %1410 }
0x105a   :  { %v1079_v6 = vadd.f32 1.0, %v1411_v3 }
0x105c   :  { %1412 = vrcp.f32 %v1079_v6  ;;  %v1091_v12 = vand.u32 2147483648, %v1079_v6  ;;  %v1089_v14 = vand.u32 2147483647, %v1079_v6  ;;  %vm1085_vm1 = vweird.f32 %v1079_v6 }
0x105d   :  { %1414 = vtanh.f32 %v1074_v62 }
0x105e   :  { %v1092_v16 = vor.u32 1.1754944e-38, %v1091_v12  ;;  %vm1090_vm4 = vcmp.eq.f32.partialorder %v1089_v14, 8.507059e+37 }
0x1062   :  { %v1413_v8 = vpop.eup %1412 }
0x1063   :  { %v1081_v9 = vmul.f32 %v1413_v8, %v1079_v6  ;;  %vm1086_vm0 = vweird.f32 %v1413_v8  ;;  %v1415_v18 = vpop.eup %1414 }
0x1064   :  { %vm1087_vm3 = vmor %vm1085_vm1, %vm1086_vm0 }
0x1065   :  { %v1082_v11 = vsub.f32 1.0, %v1081_v9 }
0x1067   :  { %v1083_v13 = vmul.f32 %v1413_v8, %v1082_v11 }
0x1069   :  { %v1084_v15 = vadd.f32 %v1413_v8, %v1083_v13 }
0x106b   :  { %v1088_v17 = vsel %vm1087_vm3, %v1413_v8, %v1084_v15 }
0x106c   :  { %v1093_v19 = vsel %vm1090_vm4, %v1092_v16, %v1088_v17 }
0x106d   :  { %v1095_v20 = vsel %vm175_vm2, %v1415_v18, %v1093_v19 }
0x106e   :  { %1107 = vrot.lane.b32.xlu2 %v1095_v20, %s1462_s12  ;;  %1101 = vrot.lane.b32.xlu1 %v1095_v20, %s1461_s11 }
0x106f   :  { %1097 = vrot.lane.b32.xlu0 %v1095_v20, %s1460_s10 }
0x1077   :  { %118 = vperm.xlu0 %1294, %v39_v22  }
0x10c8   :  { %v1108_v29 = vpop.permute.xlu2 %1107 }
0x10e0   :  { %v1102_v23 = vpop.permute.xlu1 %1101 }
0x10e1   :  { %v1104_v24 = vmul.f32 %v1102_v23, %v1043_v53  ;;  %v1098_v25 = vpop.permute.xlu0 %1097 }
0x10e2   :  { %v1100_v26 = vmul.f32 %v1098_v25, %v1095_v20 }
0x10e4   :  { %v1105_v27 = vadd.f32 %v1104_v24, %v1100_v26 }
0x10e6   :  { %1416 = vtanh.f32 %v1105_v27 }
0x10e9   :  { %v119_v31 = vpop.permute.xlu0 %118 }
0x10ea   :  { %v139_v32 = vmul.f32 %v1734_v61, %v119_v31 }
0x10ec   :  { %v1417_v28 = vpop.eup %1416  ;;  %v156_v33 = vadd.f32 %v1740_v63, %v139_v32 }
0x10ed   :  { %v1110_v30 = vmul.f32 %v1417_v28, %v1108_v29 }
0x10ef   :  { %1285 = vmatmul.msk.f32.vlgmr.msrb.gmra.mxu3 %vm181_vm5, %v1110_v30 }
0x1172   :  { %v1133_v34 = vpop.f32.mrf.mxu3 }
0x1173   :  { %v1136_v35 = vadd.f32 %v1133_v34, %v156_v33 }
0x1175   :  { %v1286_v36 = vmul.f32 -1.442695, %v1136_v35 }
0x1177   :  { %1418 = vpow2.f32 %v1286_v36 }
0x117d   :  { %v1419_v37 = vpop.eup %1418 }
0x117e   :  { %v1141_v38 = vadd.f32 1.0, %v1419_v37 }
0x1180   :  { %1420 = vrcp.f32 %v1141_v38  ;;  %v1153_v42 = vand.u32 2147483648, %v1141_v38  ;;  %v1151_v44 = vand.u32 2147483647, %v1141_v38  ;;  %vm1147_vm7 = vweird.f32 %v1141_v38 }
0x1181   :  { %1422 = vtanh.f32 %v1136_v35 }
0x1182   :  { %v1154_v61 = vor.u32 1.1754944e-38, %v1153_v42  ;;  %vm1152_vm9 = vcmp.eq.f32.partialorder %v1151_v44, 8.507059e+37 }
0x1186   :  { %v1421_v39 = vpop.eup %1420 }
0x1187   :  { %v1143_v40 = vmul.f32 %v1421_v39, %v1141_v38  ;;  %vm1148_vm6 = vweird.f32 %v1421_v39  ;;  %v1423_v46 = vpop.eup %1422 }
0x1188   :  { %vm1149_vm8 = vmor %vm1147_vm7, %vm1148_vm6 }
0x1189   :  { %v1144_v41 = vsub.f32 1.0, %v1143_v40 }
0x118b   :  { %v1145_v43 = vmul.f32 %v1421_v39, %v1144_v41 }
0x118d   :  { %v1146_v45 = vadd.f32 %v1421_v39, %v1145_v43 }
0x118f   :  { %v1150_v63 = vsel %vm1149_vm8, %v1421_v39, %v1146_v45 }
0x1190   :  { %v1155_v47 = vsel %vm1152_vm9, %v1154_v61, %v1150_v63 }
0x1191   :  { %v1157_v48 = vsel %vm175_vm2, %v1423_v46, %v1155_v47  ;;  %vm1206_vm2 = vcmask 80896  }
0x1192   :  { %1169 = vrot.lane.b32.xlu0 %v1157_v48, %s1462_s12  ;;  %1163 = vrot.lane.b32.xlu2 %v1157_v48, %s1461_s11 }
0x1193   :  { %1159 = vrot.lane.b32.xlu1 %v1157_v48, %s1460_s10 }
0x119b   :  { %1180 = vperm.xlu1 %1296, %v1177_v49  }
0x11ec   :  { %v1164_v10 = vpop.permute.xlu2 %1163 }
0x11ed   :  { %v1166_v52 = vmul.f32 %v1164_v10, %v1105_v27 }
0x1204   :  { %v1170_v53 = vpop.permute.xlu0 %1169 }
0x1205   :  { %v1160_v0 = vpop.permute.xlu1 %1159 }
0x1206   :  { %v1162_v1 = vmul.f32 %v1160_v0, %v1157_v48 }
0x1208   :  { %v1167_v4 = vadd.f32 %v1166_v52, %v1162_v1 }
0x120a   :  { %1424 = vtanh.f32 %v1167_v4 }
0x120d   :  { %v1181_v55 = vpop.permute.xlu1 %1180 }
0x1210   :  { %v1425_v5 = vpop.eup %1424 }
0x1211   :  { %v1172_v54 = vmul.f32 %v1425_v5, %v1170_v53 }
0x1213   :  { %1287 = vmatmul.msk.f32.vlgmr.msra.gmra.mxu0 %vm181_vm5, %v1172_v54 }
0x1290   :  { %v1203_v56 = vpop.f32.mrf.mxu0 }
0x1291   :  { %v1204_v57 = vadd.f32 %v1203_v56, %v1181_v55 }
0x1293   :  { %v1207_v58 = vsel %vm1206_vm2, %v1204_v57, -inf }
0x1294   :  { %v1208_v59 = vrot.slane %v1207_v58, 4 }
0x1296   :  { %v1209_v60 = vmax.f32 %v1207_v58, %v1208_v59 }
0x1298   :  { %v1210_v62 = vrot.slane %v1209_v60, 2 }
0x129a   :  { %v1211_v2 = vmax.f32 %v1209_v60, %v1210_v62 }
0x129c   :  { %v1212_v3 = vrot.slane %v1211_v2, 1 }
0x129e   :  { %v1213_v6 = vmax.f32 %v1211_v2, %v1212_v3 }
0x12a0   :  { %v1214_v8 = vsub.f32 %v1204_v57, %v1213_v6 }
0x12a2   :  { %v1215_v9 = vmul.f32 1.442695, %v1214_v8 }
0x12a4   :  { %1426 = vpow2.f32 %v1215_v9 }
0x12aa   :  { %v1427_v11 = vpop.eup %1426 }
0x12ab   :  { %v1217_v12 = vsel %vm1206_vm2, %v1427_v11, 0.0 }
0x12ac   :  { %v1218_v13 = vrot.slane %v1217_v12, 4 }
0x12ae   :  { %v1219_v14 = vadd.f32 %v1218_v13, %v1217_v12 }
0x12b0   :  { %v1220_v15 = vrot.slane %v1219_v14, 2 }
0x12b2   :  { %v1221_v16 = vadd.f32 %v1220_v15, %v1219_v14 }
0x12b4   :  { %v1222_v17 = vrot.slane %v1221_v16, 1 }
0x12b6   :  { %v1223_v18 = vadd.f32 %v1222_v17, %v1221_v16 }
0x12b8   :  { %1428 = vrcp.f32 %v1223_v18  ;;  %v1235_v23 = vand.u32 2147483648, %v1223_v18  ;;  %v1233_v25 = vand.u32 2147483647, %v1223_v18  ;;  %vm1229_vm10 = vweird.f32 %v1223_v18 }
0x12ba   :  { %v1236_v27 = vor.u32 1.1754944e-38, %v1235_v23  ;;  %vm1234_vm12 = vcmp.eq.f32.partialorder %v1233_v25, 8.507059e+37 }
0x12be   :  { %v1429_v19 = vpop.eup %1428 }
0x12bf   :  { %v1225_v20 = vmul.f32 %v1429_v19, %v1223_v18  ;;  %vm1230_vm5 = vweird.f32 %v1429_v19 }
0x12c0   :  { %vm1231_vm11 = vmor %vm1229_vm10, %vm1230_vm5 }
0x12c1   :  { %v1226_v22 = vsub.f32 1.0, %v1225_v20 }
0x12c3   :  { %v1227_v24 = vmul.f32 %v1429_v19, %v1226_v22 }
0x12c5   :  { %v1228_v26 = vadd.f32 %v1429_v19, %v1227_v24 }
0x12c7   :  { %v1232_v28 = vsel %vm1231_vm11, %v1429_v19, %v1228_v26 }
0x12c8   :  { %v1237_v29 = vsel %vm1234_vm12, %v1236_v27, %v1232_v28 }
0x12c9   :  { %v1238_v30 = vmul.f32 %v1427_v11, %v1237_v29 }
0x12cb   :  { %1239 = vst.msk [vmem:[#allocation3] sm:$0xff] %vm1206_vm2, %v1238_v30 }
0x12cc   :  { %1250 = dma.vmem_to_hbm [thread:$0]  %s1246_s5, 128, %s1248_s2, [#allocation4]  }
0x12cd   :  { %1456 = dma.done.wait [#allocation4], 128  }
0x12ce   :  { %1457 = vsyncadd [#allocation4], 4294967168 }
0x12cf   :  { %1255 = vsyncpa [#allocation4], 1 }

</bundles_post_ra>
